<compile_context>
chip_gen: v6e
topology: v6e:2x2x1
jax: 0.10.0
libtpu: 0.0.40
codegen_flags: <defaults>
</compile_context>

<pallas_src>
import functools

import jax
import jax.numpy as jnp
from jax import lax
from jax.experimental import pallas as pl
from jax.experimental.pallas import tpu as pltpu

_LANE = 128


def _round_up(a, m):
    return (a + m - 1) // m * m


def _gen_params(itemsize):
    """Generation-aware (vmem_limit, fused-block budget, streamed-tile target)."""
    cap = None
    try:
        cap = getattr(pltpu.get_tpu_info(), "vmem_capacity_bytes", None)
    except Exception:
        cap = None
    if cap is None:
        cap = 64 << 20                      # conservative default (v7x-sized part)
    if cap >= (96 << 20):                   # v5e / v6e: 128 MiB physical VMEM
        vmem_limit = 64 << 20
        fused_cap = 14 << 20
        stream_target = 4 << 20
    else:                                   # v7x: 64 MiB physical VMEM
        vmem_limit = 44 << 20
        fused_cap = 7 << 20
        stream_target = 3 << 20
    # Budget ~= 2x in + 2x out double buffers + in-kernel f32 temporaries.
    factor = 6.0 if itemsize < 4 else 4.5
    fused_budget = min(fused_cap, int(vmem_limit / factor))
    return vmem_limit, fused_budget, stream_target


def _supports_native_bf16():
    """bf16 VALU exists on v6e / v7x; keep f32 math on v5e and older."""
    try:
        kind = jax.devices()[0].device_kind.lower()
    except Exception:
        return False
    return not any(v in kind for v in ("v2", "v3", "v4", "v5"))


def _gates_from_pooled(pooled, w1_ref, b1_ref, w2_ref, b2_ref):
    """Gate MLP on pooled (TB, C) in f32: 1x1 conv -> ReLU -> 1x1 conv -> sigmoid.

    Implemented as VPU broadcast-multiplies + lane reductions so the tiny
    (C x C//r) mat-vecs never touch the MXU.
    """
    h = jnp.sum(pooled[:, None, :] * w1_ref[...][None, :, :], axis=-1) + b1_ref[...]
    h = jnp.maximum(h, 0.0)
    z = jnp.sum(h[:, None, :] * w2_ref[...][None, :, :], axis=-1) + b2_ref[...]
    return jax.nn.sigmoid(z)                                     # (TB, C) f32


def _apply_gates(x, gates, out_dtype, native_mul):
    if native_mul:
        # v6e/v7x bf16 I/O: multiply natively in the I/O dtype (one cast of the
        # tiny gate vector per block instead of per-element upcast/downcast).
        return x * gates.astype(out_dtype)[:, :, None]
    return (x.astype(jnp.float32) * gates[:, :, None]).astype(out_dtype)


def _ca_fused_kernel(x_ref, w1_ref, b1_ref, w2_ref, b2_ref, o_ref, *,
                     inv_hw, native_mul):
    # Single pass: pool -> gate MLP -> rescale.  The f32 upcast feeds the
    # reduction directly; the rescale re-reads x_ref (cheap VMEM vld), so no
    # full f32 copy of the block stays live across the gate computation.
    pooled = jnp.sum(x_ref[...].astype(jnp.float32), axis=-1) * inv_hw   # (TB, C)
    gates = _gates_from_pooled(pooled, w1_ref, b1_ref, w2_ref, b2_ref)
    o_ref[...] = _apply_gates(x_ref[...], gates, o_ref.dtype, native_mul)


def _ca_pool_gate_kernel(x_ref, w1_ref, b1_ref, w2_ref, b2_ref, g_ref, acc_ref, *,
                         inv_hw, hw, thw):
    # Pass 1: spatially-tiled global average pool; gate MLP on the last tile.
    k = pl.program_id(1)

    @pl.when(k == 0)
    def _():
        acc_ref[...] = jnp.zeros_like(acc_ref)

    x = x_ref[...].astype(jnp.float32)                           # (TB, C, THW)
    if hw % thw != 0:
        # Ragged final spatial tile: contents of out-of-range lanes are
        # unspecified, so mask them (no host-side padding pass needed).
        lane = lax.broadcasted_iota(jnp.int32, x.shape, 2)
        x = jnp.where(lane + k * thw < hw, x, 0.0)
    acc_ref[...] += jnp.sum(x, axis=-1)

    @pl.when(k == pl.num_programs(1) - 1)
    def _():
        pooled = acc_ref[...] * inv_hw
        g_ref[0] = _gates_from_pooled(pooled, w1_ref, b1_ref, w2_ref, b2_ref)


def _ca_scale_kernel(g_ref, x_ref, o_ref, *, native_mul):
    # Pass 2: streamed broadcast rescale (pure HBM streaming, fully parallel grid).
    o_ref[...] = _apply_gates(x_ref[...], g_ref[0], o_ref.dtype, native_mul)


def ca_layer(x, w1, b1, w2, b2, *, fused_budget_bytes=None,
             stream_block_bytes=None, donate_input=False):
    """CALayer forward. x: (B, C, H, W); w1: (C//r, C); w2: (C, C//r)."""
    B, C, H, W = x.shape
    C_red = w1.shape[0]
    HW = H * W
    itemsize = x.dtype.itemsize

    vmem_limit, fused_budget, stream_target = _gen_params(itemsize)
    if fused_budget_bytes is not None:
        fused_budget = fused_budget_bytes
    if stream_block_bytes is not None:
        stream_target = stream_block_bytes

    # (B, C, H, W) -> (B, C, HW): collapses contiguous trailing dims (no copy).
    x3 = x.reshape(B, C, HW)
    w1f = w1.astype(jnp.float32)
    w2f = w2.astype(jnp.float32)
    b1r = b1.reshape(1, C_red).astype(jnp.float32)
    b2r = b2.reshape(1, C).astype(jnp.float32)
    inv_hw = 1.0 / float(HW)
    native_mul = (x.dtype == jnp.bfloat16) and _supports_native_bf16()

    w_specs = [
        pl.BlockSpec((C_red, C), lambda *_: (0, 0)),   # w1 (resident)
        pl.BlockSpec((1, C_red), lambda *_: (0, 0)),   # b1
        pl.BlockSpec((C, C_red), lambda *_: (0, 0)),   # w2
        pl.BlockSpec((1, C), lambda *_: (0, 0)),       # b2
    ]

    def cparams(sem):
        return pltpu.CompilerParams(dimension_semantics=sem,
                                    vmem_limit_bytes=vmem_limit)

    image_bytes = C * HW * itemsize
    io_bytes = B * C * HW * itemsize
    w_bytes = int(w1.size + w2.size + b1.size + b2.size) * 4

    if image_bytes <= fused_budget:
        # ---- fused single pass: read x once, write once (2 HBM passes) -------
        # Keep >= 2 grid steps whenever B >= 2 (pipeline overlap + both v7x TCs),
        # while batching images up to ~the streaming target per step.
        min_steps = 2 if B >= 2 else 1
        tb_budget = min(fused_budget, max(stream_target, image_bytes))
        TB = 1
        for d in range(B, 0, -1):
            if B % d == 0 and B // d >= min_steps and d * image_bytes <= tb_budget:
                TB = d
                break
        nb = B // TB
        # TODO(synk): for B == 1 this is a (1,)-grid (one v7x TC); a two-pass
        # shape would feed both TCs but costs 3 HBM passes instead of 2.
        out = pl.pallas_call(
            functools.partial(_ca_fused_kernel, inv_hw=inv_hw,
                              native_mul=native_mul),
            out_shape=jax.ShapeDtypeStruct((B, C, HW), x.dtype),
            grid=(nb,),
            in_specs=[pl.BlockSpec((TB, C, HW), lambda b: (b, 0, 0))] + w_specs,
            out_specs=pl.BlockSpec((TB, C, HW), lambda b: (b, 0, 0)),
            compiler_params=cparams(("parallel",)),
            cost_estimate=pl.CostEstimate(
                flops=int(2 * B * C * HW + 4 * B * C * C_red),
                transcendentals=int(B * C),
                bytes_accessed=int(2 * io_bytes + w_bytes)),
            input_output_aliases=({0: 0} if donate_input else {}),
        )(x3, w1f, b1r, w2f, b2r)
    else:
        # ---- two passes for very large feature maps --------------------------
        THW = max(_LANE, (stream_target // (C * itemsize)) // _LANE * _LANE)
        THW = min(THW, _round_up(HW, _LANE))
        nhw = pl.cdiv(HW, THW)
        TB = 1
        for d in range(B, 0, -1):
            if B % d == 0 and d * C * THW * itemsize <= stream_target:
                TB = d
                break
        nb = B // TB

        # Pass 1: tiled pool + gate MLP -> (nb, TB, C) f32 (reduction axis last,
        # accumulator carried in VMEM scratch).
        gates = pl.pallas_call(
            functools.partial(_ca_pool_gate_kernel, inv_hw=inv_hw, hw=HW, thw=THW),
            out_shape=jax.ShapeDtypeStruct((nb, TB, C), jnp.float32),
            grid=(nb, nhw),
            in_specs=[pl.BlockSpec((TB, C, THW), lambda b, k: (b, 0, k))] + w_specs,
            out_specs=pl.BlockSpec((1, TB, C), lambda b, k: (b, 0, 0)),
            scratch_shapes=[pltpu.VMEM((TB, C), jnp.float32)],
            compiler_params=cparams(("parallel", "arbitrary")),
            cost_estimate=pl.CostEstimate(
                flops=int(B * C * HW + 4 * B * C * C_red),
                transcendentals=int(B * C),
                bytes_accessed=int(io_bytes + w_bytes)),
        )(x3, w1f, b1r, w2f, b2r)

        # Pass 2: tiled broadcast rescale, fully parallel 2-D grid.
        out = pl.pallas_call(
            functools.partial(_ca_scale_kernel, native_mul=native_mul),
            out_shape=jax.ShapeDtypeStruct((B, C, HW), x.dtype),
            grid=(nb, nhw),
            in_specs=[pl.BlockSpec((1, TB, C), lambda b, k: (b, 0, 0)),
                      pl.BlockSpec((TB, C, THW), lambda b, k: (b, 0, k))],
            out_specs=pl.BlockSpec((TB, C, THW), lambda b, k: (b, 0, k)),
            compiler_params=cparams(("parallel", "parallel")),
            cost_estimate=pl.CostEstimate(
                flops=int(B * C * HW),
                transcendentals=0,
                bytes_accessed=int(2 * io_bytes)),
        )(gates, x3)

    return out.reshape(B, C, H, W)


def ca_layer_ref(x, w1, b1, w2, b2):
    """Pure-JAX reference matching PyTorch CALayer.forward semantics."""
    xf = x.astype(jnp.float32)
    y = jnp.mean(xf, axis=(2, 3), keepdims=True)                 # (B, C, 1, 1)
    y = jnp.einsum('rc,bcij->brij', w1, y) + b1.reshape(1, -1, 1, 1)
    y = jnp.maximum(y, 0.0)
    y = jnp.einsum('cr,brij->bcij', w2, y) + b2.reshape(1, -1, 1, 1)
    y = jax.nn.sigmoid(y)
    return (xf * y).astype(x.dtype)


def _make_case(key, B, C, H, W, reduction):
    C_red = max(1, C // reduction)
    kx, k1, k2, k3, k4 = jax.random.split(key, 5)
    x = jax.random.normal(kx, (B, C, H, W), dtype=jnp.float32)
    w1 = jax.random.normal(k1, (C_red, C), dtype=jnp.float32) * (1.0 / C) ** 0.5
    b1 = jax.random.normal(k2, (C_red,), dtype=jnp.float32) * 0.1
    w2 = jax.random.normal(k3, (C, C_red), dtype=jnp.float32) * (1.0 / C_red) ** 0.5
    b2 = jax.random.normal(k4, (C,), dtype=jnp.float32) * 0.1
    return x, w1, b1, w2, b2


if __name__ == "__main__":
    key = jax.random.PRNGKey(0)
    ka, kb, kc, kd = jax.random.split(key, 4)

    # Case 1: module config (channel=64, reduction=16) -> fused single-pass path.
    args = _make_case(ka, 2, 64, 16, 16, 16)
    out = jax.block_until_ready(ca_layer(*args))
    ref = ca_layer_ref(*args)
    assert out.shape == args[0].shape and out.dtype == args[0].dtype
    assert jnp.allclose(out, ref, atol=1e-5, rtol=1e-5), "fused path mismatch"

    # Case 2: force the two-pass path (tiled pool+gates, then parallel rescale).
    args = _make_case(kb, 2, 32, 32, 32, 8)
    out = jax.block_until_ready(
        ca_layer(*args, fused_budget_bytes=16 * 1024, stream_block_bytes=32 * 1024))
    ref = ca_layer_ref(*args)
    assert jnp.allclose(out, ref, atol=1e-5, rtol=1e-5), "tiled path mismatch"

    # Case 3: HW not a multiple of 128, fused path (full-extent last block dim).
    args = _make_case(kc, 2, 16, 10, 10, 4)
    out = jax.block_until_ready(ca_layer(*args))
    ref = ca_layer_ref(*args)
    assert jnp.allclose(out, ref, atol=1e-5, rtol=1e-5), "ragged fused mismatch"

    # Case 4: HW not a multiple of the spatial tile, forced two-pass path
    # (exercises the in-kernel ragged-tile mask and clipped edge writes).
    args = _make_case(kd, 2, 16, 20, 20, 4)
    out = jax.block_until_ready(
        ca_layer(*args, fused_budget_bytes=8 * 1024, stream_block_bytes=16 * 1024))
    ref = ca_layer_ref(*args)
    assert jnp.allclose(out, ref, atol=1e-5, rtol=1e-5), "ragged tiled mismatch"

    # Case 5: bf16 I/O (halves HBM traffic; gate MLP stays f32; rescale is
    # native bf16 on v6e/v7x, f32 on v5e).
    x, w1, b1, w2, b2 = _make_case(ka, 2, 64, 16, 16, 16)
    xb = x.astype(jnp.bfloat16)
    out = jax.block_until_ready(ca_layer(xb, w1, b1, w2, b2))
    ref = ca_layer_ref(xb, w1, b1, w2, b2)
    assert out.dtype == jnp.bfloat16
    assert jnp.allclose(out.astype(jnp.float32), ref.astype(jnp.float32),
                        atol=5e-2, rtol=5e-2), "bf16 path mismatch"

    print("KERNEL_OK")
</pallas_src>

<mosaic_0001>
module attributes {stable_mosaic.version = 11 : i64} {
  func.func @_ca_fused_kernel(%arg0: i32, %arg1: memref<1x64x256xf32, #tpu.memory_space<vmem>>, %arg2: memref<4x64xf32, #tpu.memory_space<vmem>>, %arg3: memref<1x4xf32, #tpu.memory_space<vmem>>, %arg4: memref<64x4xf32, #tpu.memory_space<vmem>>, %arg5: memref<1x64xf32, #tpu.memory_space<vmem>>, %arg6: memref<1x64x256xf32, #tpu.memory_space<vmem>>) attributes {dimension_semantics = [#tpu.dimension_semantics<parallel>], iteration_bounds = array<i64: 2>, scalar_prefetch = 0 : i64, scratch_operands = 0 : i64, tpu.core_type = #tpu.core_type<tc>, window_params = [{transform_indices = @transform_0, window_bounds = array<i64: 1, 64, 256>}, {pipeline_mode = #tpu.pipeline_mode<synchronous>, transform_indices = @transform_1, window_bounds = array<i64: 4, 64>}, {pipeline_mode = #tpu.pipeline_mode<synchronous>, transform_indices = @transform_2, window_bounds = array<i64: 1, 4>}, {pipeline_mode = #tpu.pipeline_mode<synchronous>, transform_indices = @transform_3, window_bounds = array<i64: 64, 4>}, {pipeline_mode = #tpu.pipeline_mode<synchronous>, transform_indices = @transform_4, window_bounds = array<i64: 1, 64>}, {transform_indices = @transform_5, window_bounds = array<i64: 1, 64, 256>}]} {
    %c0 = arith.constant 0 : index
    %c0_0 = arith.constant 0 : index
    %c0_1 = arith.constant 0 : index
    %0 = vector.load %arg1[%c0, %c0_0, %c0_1] : memref<1x64x256xf32, #tpu.memory_space<vmem>>, vector<1x64x256xf32>
    %cst = arith.constant dense<0.000000e+00> : vector<1x64xf32>
    %1 = vector.multi_reduction <add>, %0, %cst [2] : vector<1x64x256xf32> to vector<1x64xf32>
    %cst_2 = arith.constant 3.906250e-03 : f32
    %2 = vector.broadcast %cst_2 : f32 to vector<1x64xf32>
    %3 = arith.mulf %1, %2 : vector<1x64xf32>
    %4 = vector.shape_cast %3 : vector<1x64xf32> to vector<1x1x64xf32>
    %c0_3 = arith.constant 0 : index
    %c0_4 = arith.constant 0 : index
    %5 = vector.load %arg2[%c0_3, %c0_4] : memref<4x64xf32, #tpu.memory_space<vmem>>, vector<4x64xf32>
    %6 = vector.shape_cast %5 : vector<4x64xf32> to vector<1x4x64xf32>
    %7 = vector.broadcast %4 : vector<1x1x64xf32> to vector<1x4x64xf32>
    %8 = arith.mulf %7, %6 : vector<1x4x64xf32>
    %cst_5 = arith.constant dense<0.000000e+00> : vector<1x4xf32>
    %9 = vector.multi_reduction <add>, %8, %cst_5 [2] : vector<1x4x64xf32> to vector<1x4xf32>
    %c0_6 = arith.constant 0 : index
    %c0_7 = arith.constant 0 : index
    %10 = vector.load %arg3[%c0_6, %c0_7] : memref<1x4xf32, #tpu.memory_space<vmem>>, vector<1x4xf32>
    %11 = arith.addf %9, %10 : vector<1x4xf32>
    %cst_8 = arith.constant 0.000000e+00 : f32
    %12 = vector.broadcast %cst_8 : f32 to vector<1x4xf32>
    %13 = arith.maximumf %11, %12 : vector<1x4xf32>
    %14 = vector.shape_cast %13 : vector<1x4xf32> to vector<1x1x4xf32>
    %c0_9 = arith.constant 0 : index
    %c0_10 = arith.constant 0 : index
    %15 = vector.load %arg4[%c0_9, %c0_10] : memref<64x4xf32, #tpu.memory_space<vmem>>, vector<64x4xf32>
    %16 = vector.shape_cast %15 : vector<64x4xf32> to vector<1x64x4xf32>
    %17 = vector.broadcast %14 : vector<1x1x4xf32> to vector<1x64x4xf32>
    %18 = arith.mulf %17, %16 : vector<1x64x4xf32>
    %cst_11 = arith.constant dense<0.000000e+00> : vector<1x64xf32>
    %19 = vector.multi_reduction <add>, %18, %cst_11 [2] : vector<1x64x4xf32> to vector<1x64xf32>
    %c0_12 = arith.constant 0 : index
    %c0_13 = arith.constant 0 : index
    %20 = vector.load %arg5[%c0_12, %c0_13] : memref<1x64xf32, #tpu.memory_space<vmem>>, vector<1x64xf32>
    %21 = arith.addf %19, %20 : vector<1x64xf32>
    %22 = arith.negf %21 : vector<1x64xf32>
    %23 = math.exp %22 : vector<1x64xf32>
    %cst_14 = arith.constant 1.000000e+00 : f32
    %24 = vector.broadcast %cst_14 : f32 to vector<1x64xf32>
    %25 = arith.addf %24, %23 : vector<1x64xf32>
    %26 = arith.divf %24, %25 : vector<1x64xf32>
    %c0_15 = arith.constant 0 : index
    %c0_16 = arith.constant 0 : index
    %c0_17 = arith.constant 0 : index
    %27 = vector.load %arg1[%c0_15, %c0_16, %c0_17] : memref<1x64x256xf32, #tpu.memory_space<vmem>>, vector<1x64x256xf32>
    %28 = vector.shape_cast %26 : vector<1x64xf32> to vector<1x64x1xf32>
    %29 = vector.broadcast %28 : vector<1x64x1xf32> to vector<1x64x256xf32>
    %30 = arith.mulf %27, %29 : vector<1x64x256xf32>
    %c0_18 = arith.constant 0 : index
    %c0_19 = arith.constant 0 : index
    %c0_20 = arith.constant 0 : index
    %31 = vector.load %arg6[%c0_18, %c0_19, %c0_20] : memref<1x64x256xf32, #tpu.memory_space<vmem>>, vector<1x64x256xf32>
    tpu.vector_store %arg6[%c0_18, %c0_19, %c0_20], %30 {strides = array<i32>} : memref<1x64x256xf32, #tpu.memory_space<vmem>>, vector<1x64x256xf32>,
    return
  }
  func.func @transform_0(%arg0: i32) -> (i32, i32, i32) {
    %c0_i32 = arith.constant 0 : i32
    %c0_i32_0 = arith.constant 0 : i32
    %c0_i32_1 = arith.constant 0 : i32
    return %arg0, %c0_i32, %c0_i32_0 : i32, i32, i32
  }
  func.func @transform_1(%arg0: i32) -> (i32, i32) {
    %c0_i32 = arith.constant 0 : i32
    %c0_i32_0 = arith.constant 0 : i32
    %c0_i32_1 = arith.constant 0 : i32
    return %c0_i32, %c0_i32_0 : i32, i32
  }
  func.func @transform_2(%arg0: i32) -> (i32, i32) {
    %c0_i32 = arith.constant 0 : i32
    %c0_i32_0 = arith.constant 0 : i32
    %c0_i32_1 = arith.constant 0 : i32
    return %c0_i32, %c0_i32_0 : i32, i32
  }
  func.func @transform_3(%arg0: i32) -> (i32, i32) {
    %c0_i32 = arith.constant 0 : i32
    %c0_i32_0 = arith.constant 0 : i32
    %c0_i32_1 = arith.constant 0 : i32
    return %c0_i32, %c0_i32_0 : i32, i32
  }
  func.func @transform_4(%arg0: i32) -> (i32, i32) {
    %c0_i32 = arith.constant 0 : i32
    %c0_i32_0 = arith.constant 0 : i32
    %c0_i32_1 = arith.constant 0 : i32
    return %c0_i32, %c0_i32_0 : i32, i32
  }
  func.func @transform_5(%arg0: i32) -> (i32, i32, i32) {
    %c0_i32 = arith.constant 0 : i32
    %c0_i32_0 = arith.constant 0 : i32
    %c0_i32_1 = arith.constant 0 : i32
    return %arg0, %c0_i32, %c0_i32_0 : i32, i32, i32
  }
}

</mosaic_0001>

<bundles_post_ra>
// kernel: tpu_custom_call.1
= control target key start
LH: loop header
LB: loop body
LE: loop exit
PB: predicated region body
PF: predicated region fallthrough
CT: control target
= control target key end

     0   :  { %10 = vsyncpa [#allocation3], 0  ;;  %s3463_s0 = inlined_call_operand.hbm [shape: f32[2,64,256], index: 0, kind: input, shape index: {}]   ;;  %s3464_s1 = inlined_call_operand.vmem [shape: f32[4,64], index: 1, kind: input, shape index: {}]   ;;  %s3465_s2 = inlined_call_operand.vmem [shape: f32[1,4], index: 2, kind: input, shape index: {}]   ;;  %s3466_s3 = inlined_call_operand.vmem [shape: f32[64,4], index: 3, kind: input, shape index: {}]   ;;  %s3467_s4 = inlined_call_operand.vmem [shape: f32[1,64], index: 4, kind: input, shape index: {}]   ;;  %s3468_s5 = inlined_call_operand.hbm [shape: f32[2,64,256], index: 5, kind: output, shape index: {}]  }
   0x1   :  { %12 = vsyncpa [#allocation3 + $0x1], 0 }
   0x2   :  { %13 = vsyncpa [#allocation4], 0 }
   0x3   :  { %15 = vsyncpa [#allocation4 + $0x1], 0  ;;  %s2535_s18 = smov 0   ;;  %s2537_s19 = smov 0  }
   0x4   :  { %s2539_s20 = smov 0   ;;  %s2541_s21 = smov 0  }
   0x5 LB: > { %s2556_s22 = sadd.s32 4294967295, %s2496_s21   ;;  %s2277_s23 = sadd.s32 4294967294, %s2496_s21   ;;  %s2496_s21 = sphi %s2541_s21, %s3483_s21   ;;  %s2492_s20 = sphi %s2539_s20, %s3482_s20   ;;  %s2488_s19 = sphi %s2537_s19, %s3481_s19   ;;  %s2484_s18 = sphi %s2535_s18, %s3480_s18  }
   0x6   : > { %s2560_s24 = sadd.s32 1, %s2496_s21   ;;  %s28_s25 = sadd.s32 1, %s2492_s20 }
   0x7   : > { %s25_s26 = ssub.s32 %s2496_s21, %s2560_s24  ;;  %p35_p0 = scmp.ne.s32.totalorder %s2492_s20, %s2488_s19 }
   0x8   : > { %p26_p1 = scmp.eq.s32.totalorder %s25_s26, 0  ;;  %p36_p2 = scmp.eq.s32.totalorder %s2496_s21, 0 }
   0x9   : > { %p41_p3 = scmp.ne.s32.totalorder %s2488_s19, %s2484_s18  ;;  %p42_p4 = scmp.eq.s32.totalorder %s2556_s22, 0 }
   0xa   : > { %s2572_s27 = scalar_select %p26_p1, %s2492_s20, %s28_s25  }
   0xb   : > { %p2574_p5 = por %p36_p2, %p35_p0  ;;  %p2578_p6 = por %p42_p4, %p41_p3 }
   0xc   : > { %p149_p7 = scmp.eq.s32.totalorder %s2556_s22, 1  ;;  %p155_p8 = scmp.eq.s32.totalorder %s2277_s23, 1 }
   0xd   : > { %s3472_s29 = scalar_select %p2578_p6, 1, 0 }
   0xe   : > { %p2315_p10 = scmp.lt.s32.totalorder %s2496_s21, 2  ;;  %p2585_p11 = por %p149_p7, %p35_p0 }
   0xf   : > { %p2589_p12 = por %p155_p8, %p41_p3  ;;  %s187_s7 = sand.u32 1, %s2492_s20  }
  0x10   : > { %s3473_s30 = scalar_select %p2585_p11, 1, 0 }
  0x11   : > { %s3474_s6 = scalar_select %p2589_p12, 1, 0 }
  0x12   : > { %s2301_s8 = sshll.u32 %s2496_s21, 11  ;;  %s2280_s9 = sshll.u32 %s187_s7, 7 }
  0x13   : > { %s2598_s12 = scalar_lea.hbm %s3463_s0, %s2301_s8  ;;  %s191_s13 = scalar_lea.vmem [#allocation2], %s2280_s9 }
  0x14   : > { %s198_s14 = sshll.u32 %s191_s13, 4  ;;  %p2602_p13 = pnand %p2315_p10, %p2574_p5  ;;  %s2606_s14 = int_to_ptr.vmem [resolvable:$true] %s198_s14 }
  0x15   : > { %s2608_s16 = scalar_lea.sflag [#allocation3], %s187_s7  ;;  %s2404_s17 = scalar_lea.hbm %s2598_s12, 2048 }
  0x16   : > { %p2405_p0 = scmp.ne.s32.totalorder %s2598_s12, %s2404_s17  ;;  %p2406_p1 = pneg %p2602_p13 }
  0x17   : > { %s2409_s26 = scalar_lea.hbm %s3463_s0, 4096  ;;  %p2410_p4 = scmp.lt.s32.totalorder %s2598_s12, %s3463_s0 }
  0x18   : > { %p2407_p2 = pnand %p2406_p1, %p2405_p0  ;;  %p2411_p5 = scmp.lt.s32.totalorder %s2409_s26, %s2404_s17 }
  0x1a   : > { %p2408_p3 = pneg %p2407_p2  ;;  %p2412_p7 = por %p2411_p5, %p2410_p4 }
  0x1c   : > { %p2413_p8 = pnand %p2412_p7, %p2408_p3 }
  0x1e   : > { %2416 = shalt.err (!%p2413_p8)
}
  0x1f   : > { %s2417_s7 = scalar_lea.vmem %s2606_s14, 2048  ;;  %s2498_s9 = smov [#allocation2]  }
  0x20   : > { %p2418_p10 = scmp.ne.s32.totalorder %s2606_s14, %s2417_s7  ;;  %s2422_s10 = sshll.u32 %s2498_s9, 4  ;;  %s2423_s10 = int_to_ptr.vmem [resolvable:$false] %s2422_s10 }
  0x21   : > { %s2424_s11 = scalar_lea.vmem %s2423_s10, 4096  ;;  %p2425_p2 = scmp.lt.s32.totalorder %s2606_s14, %s2423_s10 }
  0x22   : > { %p2420_p9 = pnand %p2418_p10, %p2406_p1  ;;  %p2426_p12 = scmp.lt.s32.totalorder %s2424_s11, %s2417_s7 }
  0x24   : > { %p2421_p0 = pneg %p2420_p9  ;;  %p2427_p11 = por %p2426_p12, %p2425_p2 }
  0x26   : > { %p2428_p6 = pnand %p2427_p11, %p2421_p0 }
  0x28   : > { %2431 = shalt.err (!%p2428_p6)
}
  0x29   : > { %s2499_s13 = smov 256   ;;  %s2500_s17 = smov 16  }
  0x2a   : > { %2310 = dma.hbm_to_vmem [thread:$0]  (!%p2602_p13), %s2598_s12, 2048, %s2606_s14, %s2608_s16, %s2499_s13, %s2499_s13, %s2500_s17  }
  0x2b   : > { %p2283_p9 = scmp.ge.s32.totalorder %s2496_s21, 1  ;;  %p206_p1 = scmp.lt.s32.totalorder %s2496_s21, 3 }
  0x2d   : > { %p207_p3 = pnand %p2283_p9, %p206_p1 }
  0x2e   : > { %s2632_s23 = sand.u32 (!%p207_p3), 1, %s2488_s19   ;;  %p3476_p6 = scmp.ne.s32.totalorder (!%p207_p3), %s3472_s29, 0 }
  0x2f   : > { %210 = sbr.rel (%p207_p3) target bundleno = 1118 (0x45e), region = 40  ;;  %s2284_s25 = sshll.u32 (!%p207_p3), %s2632_s23, 7 }
  0x30   : > { %s213_s26 = scalar_lea.sflag (!%p207_p3), [#allocation3], %s2632_s23  ;;  %s2638_s28 = scalar_lea.vmem (!%p207_p3), [#allocation2], %s2284_s25 }
  0x34   : > { %2475 = dma.done.wait (%p3476_p6), %s213_s26, 2048  }
  0x35   : > { %2477 = vsyncadd (%p3476_p6), %s213_s26, 4294965248  ;;  %v247_v0 = vld [vmem:[%s2638_s28 + $0x20] sm:$0xff]  ;;  %v248_v1 = vld [vmem:[%s2638_s28 + $0x28] sm:$0xff]  ;;  %v293_v24 = vlaneseq  ;;  %v2501_v29 = vmov 0   ;;  %vm636_vm0 = vcmask 130112   ;;  %vm643_vm1 = vcmask 195712  }
  0x36   : > { %v243_v2 = vld [vmem:[%s2638_s28] sm:$0xff]  ;;  %v265_v3 = vadd.f32 %v248_v1, %v247_v0  ;;  %v244_v4 = vld [vmem:[%s2638_s28 + $0x8] sm:$0xff]  ;;  %v249_v5 = vld [vmem:[%s2638_s28 + $0x30] sm:$0xff]  ;;  %2355 = vset.pattern.permute.xlu1 %v2501_v29  ;;  %2354 = vset.pattern.permute.xlu0 %v2501_v29  ;;  %vm650_vm2 = vcmask 261312   ;;  %vm657_vm3 = vcmask 326912   ;;  %vm664_vm4 = vcmask 392512  }
  0x37   : > { %v250_v6 = vld [vmem:[%s2638_s28 + $0x38] sm:$0xff]  ;;  %v259_v7 = vadd.f32 %v244_v4, %v243_v2  ;;  %v245_v8 = vld [vmem:[%s2638_s28 + $0x10] sm:$0xff]  ;;  %v251_v14 = vld [vmem:[%s2638_s28 + $0x40] sm:$0xff]  ;;  %v2661_v25 = vshrl.u32 %v293_v24, 7  ;;  %vm671_vm5 = vcmask 458112   ;;  %vm678_vm6 = vcmask 523712  }
  0x38   : > { %v246_v9 = vld [vmem:[%s2638_s28 + $0x18] sm:$0xff]  ;;  %266 = vadd.xlane.f32.xlu1 %v265_v3  ;;  %v268_v10 = vadd.f32 %v250_v6, %v249_v5  ;;  %v253_v12 = vld [vmem:[%s2638_s28 + $0x50] sm:$0xff]  ;;  %v252_v15 = vld [vmem:[%s2638_s28 + $0x48] sm:$0xff]  ;;  %vm797_vm7 = vcmask 1041409   ;;  %vm799_vm8 = vcmask 1042434   ;;  %vm801_vm9 = vcmask 1043459  }
  0x39   : > { %260 = vadd.xlane.f32.xlu0 %v259_v7  ;;  %v262_v11 = vadd.f32 %v246_v9, %v245_v8  ;;  %v254_v13 = vld [vmem:[%s2638_s28 + $0x58] sm:$0xff]  ;;  %v271_v17 = vadd.f32 %v252_v15, %v251_v14  ;;  %v257_v18 = vld [vmem:[%s2638_s28 + $0x70] sm:$0xff]  ;;  %v255_v20 = vld [vmem:[%s2638_s28 + $0x60] sm:$0xff]  ;;  %v2664_v26 = vsub.s32 0, %v2661_v25  ;;  %v2671_v30 = vsub.s32 1, %v2661_v25  ;;  %s3381_s11 = scalar_lea.vmem [#allocation5], %s2284_s25 }
  0x3a   : > { %v274_v16 = vadd.f32 %v254_v13, %v253_v12  ;;  %v258_v19 = vld [vmem:[%s2638_s28 + $0x78] sm:$0xff]  ;;  %v256_v21 = vld [vmem:[%s2638_s28 + $0x68] sm:$0xff]  ;;  %v291_v27 = vld [vmem:[%s3464_s1] sm:$0xf]  ;;  %v2675_v32 = vsub.s32 2, %v2661_v25  ;;  %v2679_v34 = vsub.s32 3, %v2661_v25 }
  0x3b   : > { %v280_v22 = vadd.f32 %v258_v19, %v257_v18  ;;  %v277_v23 = vadd.f32 %v256_v21, %v255_v20  ;;  %v296_v28 = vrot.slane %v291_v27, %v2664_v26  ;;  %v331_v31 = vrot.slane %v291_v27, %v2671_v30  ;;  %s2302_s25 = sshll.u32 %s2556_s22, 11  ;;  %s2204_s13 = sshll.u32 %s3381_s11, 4  ;;  %s3414_s13 = int_to_ptr.vmem [resolvable:$true] %s2204_s13 }
  0x3c   : > { %269 = vadd.xlane.f32.xlu1 %v268_v10  ;;  %v366_v33 = vrot.slane %v291_v27, %v2675_v32  ;;  %v401_v35 = vrot.slane %v291_v27, %v2679_v34  ;;  %vm804_vm10 = vcmask 519168   ;;  %vm1927_vm11 = vcmask 1044484   ;;  %s3412_s29 = scalar_lea.hbm %s3468_s5, %s2302_s25  ;;  %s2191_s22 = scalar_lea.sflag [#allocation4], %s2632_s23 }
  0x3d   : > { %263 = vadd.xlane.f32.xlu0 %v262_v11  ;;  %vm1929_vm12 = vcmask 1045509   ;;  %vm1931_vm13 = vcmask 1046534   ;;  %vm1933_vm14 = vcmask 1047559   ;;  %vm1992_vm15 = vcmask 31744   ;;  %s2432_s12 = scalar_lea.vmem %s3414_s13, 2048  ;;  %p3477_p12 = scmp.ne.s32.totalorder %s3473_s30, 0 }
  0x3e   : > { %p2433_p11 = scmp.ne.s32.totalorder %s3414_s13, %s2432_s12  ;;  %s2502_s14 = smov [#allocation5]  }
  0x3f   : > { %s2436_s15 = sshll.u32 %s2502_s14, 4  ;;  %s2437_s15 = int_to_ptr.vmem [resolvable:$false] %s2436_s15 }
  0x40   : > { %275 = vadd.xlane.f32.xlu1 %v274_v16  ;;  %p2434_p13 = pnand %p2433_p11, %p3477_p12  ;;  %s2438_s16 = scalar_lea.vmem %s2437_s15, 4096 }
  0x41   : > { %272 = vadd.xlane.f32.xlu0 %v271_v17  ;;  %p2439_p5 = scmp.lt.s32.totalorder %s3414_s13, %s2437_s15  ;;  %p2440_p7 = scmp.lt.s32.totalorder %s2438_s16, %s2432_s12 }
  0x42   : > { %p2435_p4 = pneg %p2434_p13 }
  0x43   : > { %p2441_p8 = por %p2440_p7, %p2439_p5 }
  0x44   : > { %281 = vadd.xlane.f32.xlu1 %v280_v22 }
  0x45   : > { %278 = vadd.xlane.f32.xlu0 %v277_v23  ;;  %p2442_p10 = pnand %p2441_p8, %p2435_p4 }
  0x55   : > { %302 = vbcast.lane.b32.xlu1 %v296_v28, 264 }
  0x59   : > { %306 = vbcast.lane.b32.xlu1 %v296_v28, 272 }
  0x5b   : > { %298 = vbcast.lane.b32.xlu0 %v296_v28, 256 }
  0x5d   : > { %310 = vbcast.lane.b32.xlu1 %v296_v28, 280 }
  0x5f   : > { %314 = vbcast.lane.b32.xlu0 %v296_v28, 288 }
  0x61   : > { %318 = vbcast.lane.b32.xlu1 %v296_v28, 296 }
  0x63   : > { %322 = vbcast.lane.b32.xlu0 %v296_v28, 304 }
  0x65   : > { %326 = vbcast.lane.b32.xlu1 %v296_v28, 312 }
  0x67   : > { %333 = vbcast.lane.b32.xlu0 %v331_v31, 256 }
  0x69   : > { %337 = vbcast.lane.b32.xlu1 %v331_v31, 264 }
  0x6b   : > { %341 = vbcast.lane.b32.xlu0 %v331_v31, 272 }
  0x6d   : > { %345 = vbcast.lane.b32.xlu1 %v331_v31, 280 }
  0x6f   : > { %349 = vbcast.lane.b32.xlu0 %v331_v31, 288 }
  0x71   : > { %353 = vbcast.lane.b32.xlu1 %v331_v31, 296 }
  0x73   : > { %357 = vbcast.lane.b32.xlu0 %v331_v31, 304 }
  0x75   : > { %361 = vbcast.lane.b32.xlu1 %v331_v31, 312 }
  0x77   : > { %368 = vbcast.lane.b32.xlu0 %v366_v33, 256 }
  0x79   : > { %372 = vbcast.lane.b32.xlu1 %v366_v33, 264 }
  0x7b   : > { %376 = vbcast.lane.b32.xlu0 %v366_v33, 272 }
  0x7d   : > { %380 = vbcast.lane.b32.xlu1 %v366_v33, 280 }
  0x7f   : > { %384 = vbcast.lane.b32.xlu0 %v366_v33, 288 }
  0x81   : > { %388 = vbcast.lane.b32.xlu1 %v366_v33, 296 }
  0x83   : > { %392 = vbcast.lane.b32.xlu0 %v366_v33, 304 }
  0x85   : > { %396 = vbcast.lane.b32.xlu1 %v366_v33, 312 }
  0x87   : > { %403 = vbcast.lane.b32.xlu0 %v401_v35, 256 }
  0x89   : > { %407 = vbcast.lane.b32.xlu1 %v401_v35, 264 }
  0x8b   : > { %411 = vbcast.lane.b32.xlu0 %v401_v35, 272 }
  0x8d   : > { %415 = vbcast.lane.b32.xlu1 %v401_v35, 280 }
  0x8f   : > { %419 = vbcast.lane.b32.xlu0 %v401_v35, 288 }
  0x91   : > { %423 = vbcast.lane.b32.xlu1 %v401_v35, 296 }
  0x93   : > { %427 = vbcast.lane.b32.xlu0 %v401_v35, 304 }
  0x95   : > { %431 = vbcast.lane.b32.xlu1 %v401_v35, 312 }
  0xc1   : > { %v267_v36 = vpop.xlane.xlu1 %266 }
  0xc2   : > { %v261_v37 = vpop.xlane.xlu0 %260  ;;  %v2688_v50 = vmul.f32 0.00390625, %v267_v36 }
  0xc3   : > { %v2684_v45 = vmul.f32 0.00390625, %v261_v37 }
  0xc5   : > { %v270_v38 = vpop.xlane.xlu1 %269 }
  0xc6   : > { %v264_v39 = vpop.xlane.xlu0 %263  ;;  %v2691_v54 = vmul.f32 0.00390625, %v270_v38 }
  0xc7   : > { %v2682_v44 = vmul.f32 0.00390625, %v264_v39 }
  0xc9   : > { %v276_v40 = vpop.xlane.xlu1 %275 }
  0xca   : > { %v273_v41 = vpop.xlane.xlu0 %272  ;;  %v2697_v60 = vmul.f32 0.00390625, %v276_v40 }
  0xcb   : > { %v2693_v55 = vmul.f32 0.00390625, %v273_v41 }
  0xcd   : > { %v282_v42 = vpop.xlane.xlu1 %281 }
  0xce   : > { %v279_v43 = vpop.xlane.xlu0 %278  ;;  %v2703_v2 = vmul.f32 0.00390625, %v282_v42 }
  0xcf   : > { %v2699_v61 = vmul.f32 0.00390625, %v279_v43 }
  0xd1   : > { %v303_v46 = vpop.permute.xlu1 %302 }
  0xd2   : > { %v466_v47 = vmul.f32 %v303_v46, %v2682_v44  ;;  %v299_v48 = vpop.permute.xlu0 %298 }
  0xd3   : > { %v465_v49 = vmul.f32 %v299_v48, %v2684_v45 }
  0xd4   : > { %533 = vperm.xlu1 %2355, %v466_v47  }
  0xd5   : > { %530 = vperm.xlu0 %2354, %v465_v49   ;;  %v307_v51 = vpop.permute.xlu1 %306 }
  0xd6   : > { %v467_v52 = vmul.f32 %v307_v51, %v2688_v50  ;;  %v315_v53 = vpop.permute.xlu0 %314 }
  0xd7   : > { %v469_v57 = vmul.f32 %v315_v53, %v2693_v55 }
  0xd8   : > { %536 = vperm.xlu1 %2355, %v467_v52  }
  0xd9   : > { %v311_v56 = vpop.permute.xlu1 %310 }
  0xda   : > { %v468_v58 = vmul.f32 %v311_v56, %v2691_v54  ;;  %v323_v59 = vpop.permute.xlu0 %322 }
  0xdb   : > { %v471_v63 = vmul.f32 %v323_v59, %v2699_v61 }
  0xdc   : > { %539 = vperm.xlu0 %2354, %v468_v58   ;;  %542 = vperm.xlu1 %2355, %v469_v57   ;;  %v2730_v58 = vld [vmem:[%s3466_s3 + $0x8] sm:$0xff] }
  0xdd   : > { %v319_v62 = vpop.permute.xlu1 %318 }
  0xde   : > { %v470_v0 = vmul.f32 %v319_v62, %v2697_v60  ;;  %v334_v1 = vpop.permute.xlu0 %333 }
  0xdf   : > { %v473_v4 = vmul.f32 %v334_v1, %v2684_v45 }
  0xe0   : > { %545 = vperm.xlu0 %2354, %v470_v0   ;;  %548 = vperm.xlu1 %2355, %v471_v63   ;;  %v2751_v0 = vld [vmem:[%s3466_s3 + $0x10] sm:$0xff] }
  0xe1   : > { %v327_v3 = vpop.permute.xlu1 %326 }
  0xe2   : > { %v472_v5 = vmul.f32 %v327_v3, %v2703_v2  ;;  %v342_v6 = vpop.permute.xlu0 %341 }
  0xe3   : > { %v475_v8 = vmul.f32 %v342_v6, %v2688_v50 }
  0xe4   : > { %551 = vperm.xlu0 %2354, %v472_v5   ;;  %554 = vperm.xlu1 %2355, %v473_v4   ;;  %v965_v4 = vrot.slane %v2751_v0, %v2675_v32  ;;  %v2760_v5 = vsub.s32 4, %v2661_v25 }
  0xe5   : > { %v338_v7 = vpop.permute.xlu1 %337 }
  0xe6   : > { %v474_v9 = vmul.f32 %v338_v7, %v2682_v44  ;;  %v350_v10 = vpop.permute.xlu0 %349  ;;  %v979_v7 = vrot.slane %v2751_v0, %v2760_v5 }
  0xe7   : > { %v477_v12 = vmul.f32 %v350_v10, %v2693_v55  ;;  %v2771_v10 = vld [vmem:[%s3466_s3 + $0x18] sm:$0xff] }
  0xe8   : > { %557 = vperm.xlu0 %2354, %v474_v9   ;;  %560 = vperm.xlu1 %2355, %v475_v8  }
  0xe9   : > { %v346_v11 = vpop.permute.xlu1 %345 }
  0xea   : > { %v476_v13 = vmul.f32 %v346_v11, %v2691_v54  ;;  %v358_v14 = vpop.permute.xlu0 %357 }
  0xeb   : > { %v479_v16 = vmul.f32 %v358_v14, %v2699_v61 }
  0xec   : > { %563 = vperm.xlu0 %2354, %v476_v13   ;;  %566 = vperm.xlu1 %2355, %v477_v12   ;;  %v2775_v12 = vsub.s32 5, %v2661_v25  ;;  %v1007_v13 = vrot.slane %v2771_v10, %v2664_v26 }
  0xed   : > { %v354_v15 = vpop.permute.xlu1 %353 }
  0xee   : > { %v478_v17 = vmul.f32 %v354_v15, %v2697_v60  ;;  %v369_v18 = vpop.permute.xlu0 %368  ;;  %v1021_v15 = vrot.slane %v2771_v10, %v2675_v32 }
  0xef   : > { %v481_v20 = vmul.f32 %v369_v18, %v2684_v45  ;;  %v1035_v18 = vrot.slane %v2771_v10, %v2760_v5 }
  0xf0   : > { %569 = vperm.xlu0 %2354, %v478_v17   ;;  %572 = vperm.xlu1 %2355, %v479_v16   ;;  %v2784_v17 = vsub.s32 7, %v2661_v25 }
  0xf1   : > { %v362_v19 = vpop.permute.xlu1 %361 }
  0xf2   : > { %v480_v21 = vmul.f32 %v362_v19, %v2703_v2  ;;  %v377_v22 = vpop.permute.xlu0 %376 }
  0xf3   : > { %v483_v27 = vmul.f32 %v377_v22, %v2688_v50  ;;  %v902_v22 = vrot.slane %v2730_v58, %v2671_v30 }
  0xf4   : > { %575 = vperm.xlu0 %2354, %v480_v21   ;;  %578 = vperm.xlu1 %2355, %v481_v20   ;;  %v2794_v21 = vld [vmem:[%s3466_s3 + $0x20] sm:$0xff] }
  0xf5   : > { %v373_v23 = vpop.permute.xlu1 %372 }
  0xf6   : > { %v482_v28 = vmul.f32 %v373_v23, %v2682_v44  ;;  %v385_v29 = vpop.permute.xlu0 %384  ;;  %v1063_v23 = vrot.slane %v2794_v21, %v2664_v26 }
  0xf7   : > { %v485_v33 = vmul.f32 %v385_v29, %v2693_v55  ;;  %v916_v29 = vrot.slane %v2730_v58, %v2679_v34 }
  0xf8   : > { %581 = vperm.xlu0 %2354, %v482_v28   ;;  %584 = vperm.xlu1 %2355, %v483_v27   ;;  %v909_v27 = vrot.slane %v2730_v58, %v2675_v32  ;;  %v1077_v28 = vrot.slane %v2794_v21, %v2675_v32 }
  0xf9   : > { %v381_v31 = vpop.permute.xlu1 %380 }
  0xfa   : > { %v484_v35 = vmul.f32 %v381_v31, %v2691_v54  ;;  %v393_v36 = vpop.permute.xlu0 %392  ;;  %v1091_v31 = vrot.slane %v2794_v21, %v2760_v5 }
  0xfb   : > { %v487_v38 = vmul.f32 %v393_v36, %v2699_v61  ;;  %v2815_v36 = vld [vmem:[%s3466_s3 + $0x28] sm:$0xff] }
  0xfc   : > { %587 = vperm.xlu0 %2354, %v484_v35   ;;  %590 = vperm.xlu1 %2355, %v485_v33   ;;  %v923_v33 = vrot.slane %v2730_v58, %v2760_v5 }
  0xfd   : > { %v389_v37 = vpop.permute.xlu1 %388 }
  0xfe   : > { %v486_v39 = vmul.f32 %v389_v37, %v2697_v60  ;;  %v404_v40 = vpop.permute.xlu0 %403  ;;  %v930_v37 = vrot.slane %v2730_v58, %v2775_v12 }
  0xff   : > { %v489_v42 = vmul.f32 %v404_v40, %v2684_v45  ;;  %v1133_v40 = vrot.slane %v2815_v36, %v2675_v32 }
 0x100   : > { %593 = vperm.xlu0 %2354, %v486_v39   ;;  %596 = vperm.xlu1 %2355, %v487_v38   ;;  %v1119_v38 = vrot.slane %v2815_v36, %v2664_v26  ;;  %v944_v39 = vrot.slane %v2730_v58, %v2784_v17 }
 0x101   : > { %v397_v41 = vpop.permute.xlu1 %396 }
 0x102   : > { %v488_v43 = vmul.f32 %v397_v41, %v2703_v2  ;;  %v412_v46 = vpop.permute.xlu0 %411 }
 0x103   : > { %v491_v48 = vmul.f32 %v412_v46, %v2688_v50 }
 0x104   : > { %599 = vperm.xlu0 %2354, %v488_v43   ;;  %602 = vperm.xlu1 %2355, %v489_v42   ;;  %v958_v42 = vrot.slane %v2751_v0, %v2671_v30  ;;  %v1147_v43 = vrot.slane %v2815_v36, %v2760_v5 }
 0x105   : > { %v408_v47 = vpop.permute.xlu1 %407 }
 0x106   : > { %v490_v49 = vmul.f32 %v408_v47, %v2682_v44  ;;  %v420_v51 = vpop.permute.xlu0 %419 }
 0x107   : > { %v493_v53 = vmul.f32 %v420_v51, %v2693_v55  ;;  %v895_v55 = vrot.slane %v2730_v58, %v2664_v26  ;;  %v2842_v51 = vld [vmem:[%s3466_s3 + $0x30] sm:$0xff] }
 0x108   : > { %605 = vperm.xlu0 %2354, %v490_v49   ;;  %608 = vperm.xlu1 %2355, %v491_v48   ;;  %v972_v48 = vrot.slane %v2751_v0, %v2679_v34 }
 0x109   : > { %v416_v52 = vpop.permute.xlu1 %415 }
 0x10a   : > { %v492_v56 = vmul.f32 %v416_v52, %v2691_v54  ;;  %v428_v57 = vpop.permute.xlu0 %427  ;;  %v2737_v54 = vsub.s32 6, %v2661_v25 }
 0x10b   : > { %v495_v50 = vmul.f32 %v428_v57, %v2699_v61  ;;  %v820_v61 = vld [vmem:[%s3466_s3] sm:$0xff]  ;;  %v1175_v57 = vrot.slane %v2842_v51, %v2664_v26 }
 0x10c   : > { %611 = vperm.xlu0 %2354, %v492_v56   ;;  %614 = vperm.xlu1 %2355, %v493_v53   ;;  %v937_v63 = vrot.slane %v2730_v58, %v2737_v54  ;;  %v839_v1 = vrot.slane %v820_v61, %v2664_v26  ;;  %v846_v3 = vrot.slane %v820_v61, %v2671_v30 }
 0x10d   : > { %v424_v45 = vpop.permute.xlu1 %423  ;;  %v853_v6 = vrot.slane %v820_v61, %v2675_v32  ;;  %v860_v8 = vrot.slane %v820_v61, %v2679_v34  ;;  %v993_v9 = vrot.slane %v2751_v0, %v2737_v54  ;;  %v867_v11 = vrot.slane %v820_v61, %v2760_v5 }
 0x10e   : > { %v494_v44 = vmul.f32 %v424_v45, %v2697_v60  ;;  %v2286_v60 = vld [vmem:[%s3465_s2] ss:$0 sm:$0xff]  ;;  %v874_v14 = vrot.slane %v820_v61, %v2775_v12  ;;  %v881_v16 = vrot.slane %v820_v61, %v2737_v54  ;;  %v888_v19 = vrot.slane %v820_v61, %v2784_v17 }
 0x10f   : > { %v1049_v20 = vrot.slane %v2771_v10, %v2737_v54  ;;  %v1105_v35 = vrot.slane %v2794_v21, %v2737_v54  ;;  %v1161_v49 = vrot.slane %v2815_v36, %v2737_v54  ;;  %v986_v56 = vrot.slane %v2751_v0, %v2775_v12 }
 0x110   : > { %617 = vperm.xlu0 %2354, %v494_v44   ;;  %620 = vperm.xlu1 %2355, %v495_v50   ;;  %v1000_v50 = vrot.slane %v2751_v0, %v2784_v17  ;;  %v1189_v44 = vrot.slane %v2842_v51, %v2675_v32  ;;  %v1028_v61 = vrot.slane %v2771_v10, %v2679_v34 }
 0x111   : > { %v432_v59 = vpop.permute.xlu1 %431 }
 0x112   : > { %v496_v62 = vmul.f32 %v432_v59, %v2703_v2  ;;  %v951_v2 = vrot.slane %v2751_v0, %v2664_v26 }
 0x114   : > { %623 = vperm.xlu0 %2354, %v496_v62   ;;  %897 = vbcast.lane.b32.xlu1 %v895_v55, 256  ;;  %v1014_v62 = vrot.slane %v2771_v10, %v2671_v30 }
 0x118   : > { %815 = vbcast.lane.b32.xlu0 %v2286_v60, 256  ;;  %939 = vbcast.lane.b32.xlu1 %v937_v63, 256 }
 0x11c   : > { %841 = vbcast.lane.b32.xlu0 %v839_v1, 256  ;;  %953 = vbcast.lane.b32.xlu1 %v951_v2, 256  ;;  %v1042_v2 = vrot.slane %v2771_v10, %v2775_v12 }
 0x120   : > { %848 = vbcast.lane.b32.xlu0 %v846_v3, 256  ;;  %967 = vbcast.lane.b32.xlu1 %v965_v4, 256 }
 0x124   : > { %855 = vbcast.lane.b32.xlu0 %v853_v6, 256  ;;  %981 = vbcast.lane.b32.xlu1 %v979_v7, 256  ;;  %v1056_v6 = vrot.slane %v2771_v10, %v2784_v17 }
 0x128   : > { %862 = vbcast.lane.b32.xlu0 %v860_v8, 256  ;;  %995 = vbcast.lane.b32.xlu1 %v993_v9, 256  ;;  %v1070_v9 = vrot.slane %v2794_v21, %v2671_v30 }
 0x12c   : > { %869 = vbcast.lane.b32.xlu0 %v867_v11, 256  ;;  %1009 = vbcast.lane.b32.xlu1 %v1007_v13, 256  ;;  %v626_v11 = vand.u32 127, %v293_v24 }
 0x130   : > { %876 = vbcast.lane.b32.xlu0 %v874_v14, 256  ;;  %1023 = vbcast.lane.b32.xlu1 %v1021_v15, 256  ;;  %v1084_v15 = vrot.slane %v2794_v21, %v2679_v34 }
 0x134   : > { %883 = vbcast.lane.b32.xlu0 %v881_v16, 256  ;;  %1037 = vbcast.lane.b32.xlu1 %v1035_v18, 256  ;;  %v631_v16 = vadd.s32 4294967288, %v626_v11 }
 0x136   : > { %v634_v24 = vsub.s32 %v631_v16, %v2661_v25 }
 0x138   : > { %890 = vbcast.lane.b32.xlu0 %v888_v19, 256  ;;  %1051 = vbcast.lane.b32.xlu1 %v1049_v20, 256  ;;  %v1098_v19 = vrot.slane %v2794_v21, %v2775_v12  ;;  %v638_v20 = vadd.s32 4294967280, %v626_v11 }
 0x13c   : > { %904 = vbcast.lane.b32.xlu0 %v902_v22, 256  ;;  %1065 = vbcast.lane.b32.xlu1 %v1063_v23, 256  ;;  %v652_v22 = vadd.s32 4294967264, %v626_v11  ;;  %v645_v23 = vadd.s32 4294967272, %v626_v11 }
 0x140   : > { %911 = vbcast.lane.b32.xlu0 %v909_v27, 256  ;;  %1079 = vbcast.lane.b32.xlu1 %v1077_v28, 256  ;;  %v666_v27 = vadd.s32 4294967248, %v626_v11 }
 0x144   : > { %918 = vbcast.lane.b32.xlu0 %v916_v29, 256  ;;  %1093 = vbcast.lane.b32.xlu1 %v1091_v31, 256  ;;  %v2903_v31 = vsub.s32 %v626_v11, %v2661_v25 }
 0x148   : > { %925 = vbcast.lane.b32.xlu0 %v923_v33, 256  ;;  %1107 = vbcast.lane.b32.xlu1 %v1105_v35, 256  ;;  %v659_v33 = vadd.s32 4294967256, %v626_v11  ;;  %v1112_v35 = vrot.slane %v2794_v21, %v2784_v17 }
 0x14c   : > { %932 = vbcast.lane.b32.xlu0 %v930_v37, 256  ;;  %1121 = vbcast.lane.b32.xlu1 %v1119_v38, 256  ;;  %v641_v37 = vsub.s32 %v638_v20, %v2661_v25  ;;  %v673_v38 = vadd.s32 4294967240, %v626_v11 }
 0x14f   : > { %v2825_v41 = vpop.permute.xlu1 %533 }
 0x150   : > { %946 = vbcast.lane.b32.xlu0 %v944_v39, 256  ;;  %1135 = vbcast.lane.b32.xlu1 %v1133_v40, 256  ;;  %v2831_v46 = vpop.permute.xlu0 %530  ;;  %v2909_v40 = vsub.s32 %v652_v22, %v2661_v25 }
 0x153   : > { %v2833_v47 = vpop.permute.xlu1 %536 }
 0x154   : > { %960 = vbcast.lane.b32.xlu0 %v958_v42, 256  ;;  %1149 = vbcast.lane.b32.xlu1 %v1147_v43, 256  ;;  %v648_v42 = vsub.s32 %v645_v23, %v2661_v25  ;;  %v2913_v43 = vsub.s32 %v666_v27, %v2661_v25  ;;  %v642_v11 = vrot.slane %v2833_v47, %v641_v37 }
 0x157   : > { %v2844_v52 = vpop.permute.xlu1 %542  ;;  %v2846_v53 = vpop.permute.xlu0 %539 }
 0x158   : > { %974 = vbcast.lane.b32.xlu0 %v972_v48, 256  ;;  %1163 = vbcast.lane.b32.xlu1 %v1161_v49, 256  ;;  %v656_v27 = vrot.slane %v2844_v52, %v2909_v40 }
 0x15b   : > { %v2852_v45 = vpop.permute.xlu1 %548  ;;  %v2854_v58 = vpop.permute.xlu0 %545 }
 0x15c   : > { %988 = vbcast.lane.b32.xlu0 %v986_v56, 256  ;;  %1177 = vbcast.lane.b32.xlu1 %v1175_v57, 256  ;;  %v2920_v57 = vsub.s32 %v659_v33, %v2661_v25 }
 0x15f   : > { %v2860_v55 = vpop.permute.xlu1 %554  ;;  %v2862_v59 = vpop.permute.xlu0 %551 }
 0x160   : > { %1002 = vbcast.lane.b32.xlu0 %v1000_v50, 256  ;;  %1191 = vbcast.lane.b32.xlu1 %v1189_v44, 256  ;;  %v683_v48 = vrot.slane %v2860_v55, %v2903_v31  ;;  %v1126_v44 = vrot.slane %v2815_v36, %v2671_v30 }
 0x163   : > { %v2866_v63 = vpop.permute.xlu1 %560  ;;  %v558_v60 = vpop.permute.xlu0 %557 }
 0x164   : > { %1016 = vbcast.lane.b32.xlu0 %v1014_v62, 256  ;;  %v687_v39 = vrot.slane %v558_v60, %v634_v24  ;;  %v692_v50 = vrot.slane %v2866_v63, %v641_v37  ;;  %v2926_v62 = vsub.s32 %v673_v38, %v2661_v25  ;;  %v649_v25 = vrot.slane %v2846_v53, %v648_v42 }
 0x166   : > { %v688_v60 = vsel %vm636_vm0, %v687_v39, %v683_v48 }
 0x167   : > { %v2870_v0 = vpop.permute.xlu1 %566  ;;  %v2872_v1 = vpop.permute.xlu0 %563 }
 0x168   : > { %1030 = vbcast.lane.b32.xlu0 %v1028_v61, 256  ;;  %v697_v55 = vrot.slane %v2872_v1, %v648_v42 }
 0x16b   : > { %v2876_v3 = vpop.permute.xlu1 %572  ;;  %v2878_v4 = vpop.permute.xlu0 %569 }
 0x16c   : > { %1044 = vbcast.lane.b32.xlu0 %v1042_v2, 256  ;;  %v635_v2 = vrot.slane %v2825_v41, %v634_v24  ;;  %v702_v41 = vrot.slane %v2870_v0, %v2909_v40  ;;  %v707_v53 = vrot.slane %v2878_v4, %v2920_v57 }
 0x16f   : > { %v579_v7 = vpop.permute.xlu1 %578  ;;  %v2882_v8 = vpop.permute.xlu0 %575 }
 0x170   : > { %1058 = vbcast.lane.b32.xlu0 %v1056_v6, 256  ;;  %v722_v61 = vrot.slane %v579_v7, %v2903_v31  ;;  %v630_v6 = vrot.slane %v2831_v46, %v2903_v31  ;;  %v693_v46 = vsel %vm643_vm1, %v692_v50, %v688_v60  ;;  %v717_v50 = vrot.slane %v2882_v8, %v2926_v62 }
 0x171   : > { %v698_v47 = vsel %vm650_vm2, %v697_v55, %v693_v46  ;;  %v670_v60 = vrot.slane %v2852_v45, %v2913_v43  ;;  %v1168_v45 = vrot.slane %v2815_v36, %v2784_v17 }
 0x172   : > { %v637_v20 = vsel %vm636_vm0, %v635_v2, %v630_v6  ;;  %v703_v39 = vsel %vm657_vm3, %v702_v41, %v698_v47 }
 0x173   : > { %v2887_v13 = vpop.permute.xlu1 %584  ;;  %v582_v14 = vpop.permute.xlu0 %581  ;;  %v708_v52 = vsel %vm664_vm4, %v707_v53, %v703_v39 }
 0x174   : > { %1072 = vbcast.lane.b32.xlu0 %v1070_v9, 256  ;;  %v726_v21 = vrot.slane %v582_v14, %v634_v24  ;;  %v731_v63 = vrot.slane %v2887_v13, %v641_v37  ;;  %v1140_v9 = vrot.slane %v2815_v36, %v2679_v34 }
 0x176   : > { %v727_v14 = vsel %vm636_vm0, %v726_v21, %v722_v61  ;;  %v712_v21 = vrot.slane %v2876_v3, %v2913_v43 }
 0x177   : > { %v2891_v18 = vpop.permute.xlu1 %590  ;;  %v2893_v10 = vpop.permute.xlu0 %587  ;;  %v732_v22 = vsel %vm643_vm1, %v731_v63, %v727_v14 }
 0x178   : > { %1086 = vbcast.lane.b32.xlu0 %v1084_v15, 256  ;;  %v736_v1 = vrot.slane %v2893_v10, %v648_v42  ;;  %v1154_v10 = vrot.slane %v2815_v36, %v2775_v12  ;;  %v741_v0 = vrot.slane %v2891_v18, %v2909_v40  ;;  %v663_v18 = vrot.slane %v2854_v58, %v2920_v57 }
 0x179   : > { %v713_v63 = vsel %vm671_vm5, %v712_v21, %v708_v52 }
 0x17a   : > { %v737_v4 = vsel %vm650_vm2, %v736_v1, %v732_v22  ;;  %v827_v22 = vld [vmem:[%s3466_s3 + $0x38] sm:$0xff] }
 0x17b   : > { %v2898_v28 = vpop.permute.xlu1 %596  ;;  %v2900_v29 = vpop.permute.xlu0 %593  ;;  %v742_v58 = vsel %vm657_vm3, %v741_v0, %v737_v4  ;;  %v1252_v4 = vrot.slane %v827_v22, %v2679_v34  ;;  %v1273_v52 = vrot.slane %v827_v22, %v2737_v54 }
 0x17c   : > { %1100 = vbcast.lane.b32.xlu0 %v1098_v19, 256  ;;  %v746_v33 = vrot.slane %v2900_v29, %v2920_v57 }
 0x17e   : > { %v747_v55 = vsel %vm664_vm4, %v746_v33, %v742_v58  ;;  %v1217_v33 = vrot.slane %v2842_v51, %v2737_v54 }
 0x17f   : > { %v603_v49 = vpop.permute.xlu1 %602  ;;  %v2917_v56 = vpop.permute.xlu0 %599 }
 0x180   : > { %1114 = vbcast.lane.b32.xlu0 %v1112_v35, 256  ;;  %v761_v13 = vrot.slane %v603_v49, %v2903_v31 }
 0x183   : > { %v609_v15 = vpop.permute.xlu1 %608  ;;  %v606_v7 = vpop.permute.xlu0 %605 }
 0x184   : > { %v765_v16 = vrot.slane %v606_v7, %v634_v24  ;;  %1128 = vbcast.lane.b32.xlu0 %v1126_v44, 256  ;;  %v770_v19 = vrot.slane %v609_v15, %v641_v37  ;;  %v644_v24 = vsel %vm643_vm1, %v642_v11, %v637_v20  ;;  %v751_v44 = vrot.slane %v2898_v28, %v2913_v43 }
 0x185   : > { %v651_v38 = vsel %vm650_vm2, %v649_v25, %v644_v24  ;;  %v677_v28 = vrot.slane %v2862_v59, %v2926_v62  ;;  %v718_v11 = vsel %vm678_vm6, %v717_v50, %v713_v63  ;;  %v1224_v20 = vrot.slane %v2842_v51, %v2784_v17 }
 0x186   : > { %v766_v23 = vsel %vm636_vm0, %v765_v16, %v761_v13  ;;  %v658_v3 = vsel %vm657_vm3, %v656_v27, %v651_v38  ;;  %v752_v25 = vsel %vm671_vm5, %v751_v44, %v747_v55  ;;  %v1203_v24 = vrot.slane %v2842_v51, %v2760_v5 }
 0x187   : > { %v615_v35 = vpop.permute.xlu1 %614  ;;  %v612_v37 = vpop.permute.xlu0 %611  ;;  %v771_v29 = vsel %vm643_vm1, %v770_v19, %v766_v23  ;;  %v665_v8 = vsel %vm664_vm4, %v663_v18, %v658_v3  ;;  %v1238_v23 = vrot.slane %v827_v22, %v2671_v30  ;;  %v1280_v18 = vrot.slane %v827_v22, %v2784_v17 }
 0x188   : > { %v775_v48 = vrot.slane %v612_v37, %v648_v42  ;;  %1142 = vbcast.lane.b32.xlu0 %v1140_v9, 256  ;;  %v780_v49 = vrot.slane %v615_v35, %v2909_v40  ;;  %v756_v40 = vrot.slane %v2917_v56, %v2926_v62  ;;  %v672_v59 = vsel %vm671_vm5, %v670_v60, %v665_v8 }
 0x189   : > { %v679_v36 = vsel %vm678_vm6, %v677_v28, %v672_v59  ;;  %v1266_v37 = vrot.slane %v827_v22, %v2775_v12 }
 0x18a   : > { %v776_v42 = vsel %vm650_vm2, %v775_v48, %v771_v29  ;;  %v798_v41 = vsel %vm797_vm7, %v718_v11, %v679_v36 }
 0x18b   : > { %v621_v61 = vpop.permute.xlu1 %620  ;;  %v618_v2 = vpop.permute.xlu0 %617  ;;  %v781_v56 = vsel %vm657_vm3, %v780_v49, %v776_v42 }
 0x18c   : > { %v785_v6 = vrot.slane %v618_v2, %v2920_v57  ;;  %1156 = vbcast.lane.b32.xlu0 %v1154_v10, 256  ;;  %v790_v9 = vrot.slane %v621_v61, %v2913_v43  ;;  %v757_v57 = vsel %vm678_vm6, %v756_v40, %v752_v25  ;;  %v1182_v43 = vrot.slane %v2842_v51, %v2671_v30 }
 0x18d   : > { %v800_v13 = vsel %vm799_vm8, %v757_v57, %v798_v41  ;;  %v1210_v10 = vrot.slane %v2842_v51, %v2775_v12  ;;  %v1231_v30 = vrot.slane %v827_v22, %v2664_v26 }
 0x18e   : > { %v786_v14 = vsel %vm664_vm4, %v785_v6, %v781_v56 }
 0x18f   : > { %v624_v1 = vpop.permute.xlu0 %623  ;;  %v791_v7 = vsel %vm671_vm5, %v790_v9, %v786_v14  ;;  %v3028_v35 = vpop.permute.xlu1 %897 }
 0x190   : > { %v795_v15 = vrot.slane %v624_v1, %v2926_v62  ;;  %1170 = vbcast.lane.b32.xlu0 %v1168_v45, 256  ;;  %v1196_v62 = vrot.slane %v2842_v51, %v2679_v34  ;;  %v1245_v34 = vrot.slane %v827_v22, %v2675_v32  ;;  %v1259_v51 = vrot.slane %v827_v22, %v2760_v5 }
 0x192   : > { %v796_v46 = vsel %vm678_vm6, %v795_v15, %v791_v7 }
 0x193   : > { %v3004_v16 = vpop.permute.xlu0 %815  ;;  %v802_v47 = vsel %vm801_vm9, %v796_v46, %v800_v13  ;;  %v3033_v39 = vpop.permute.xlu1 %939 }
 0x194   : > { %v805_v53 = vsel %vm804_vm10, %v802_v47, 0.0  ;;  %1184 = vbcast.lane.b32.xlu0 %v1182_v43, 256 }
 0x195   : > { %806 = vadd.xlane.f32.xlu1 %v805_v53 }
 0x197   : > { %v3009_v19 = vpop.permute.xlu0 %841  ;;  %v3037_v21 = vpop.permute.xlu1 %953 }
 0x198   : > { %1198 = vbcast.lane.b32.xlu0 %v1196_v62, 256 }
 0x19b   : > { %v3015_v0 = vpop.permute.xlu0 %848  ;;  %v3040_v26 = vpop.permute.xlu1 %967 }
 0x19c   : > { %1212 = vbcast.lane.b32.xlu0 %v1210_v10, 256 }
 0x19f   : > { %v3023_v27 = vpop.permute.xlu0 %855  ;;  %v3042_v49 = vpop.permute.xlu1 %981 }
 0x1a0   : > { %1226 = vbcast.lane.b32.xlu0 %v1224_v20, 256 }
 0x1a3   : > { %v863_v38 = vpop.permute.xlu0 %862  ;;  %v3044_v50 = vpop.permute.xlu1 %995 }
 0x1a4   : > { %1240 = vbcast.lane.b32.xlu0 %v1238_v23, 256 }
 0x1a6   : > { %1205 = vbcast.lane.b32.xlu1 %v1203_v24, 256 }
 0x1a7   : > { %v870_v48 = vpop.permute.xlu0 %869  ;;  %v3046_v44 = vpop.permute.xlu1 %1009 }
 0x1a8   : > { %1254 = vbcast.lane.b32.xlu0 %v1252_v4, 256 }
 0x1aa   : > { %1219 = vbcast.lane.b32.xlu1 %v1217_v33, 256 }
 0x1ab   : > { %v877_v12 = vpop.permute.xlu0 %876  ;;  %v3048_v5 = vpop.permute.xlu1 %1023 }
 0x1ac   : > { %1268 = vbcast.lane.b32.xlu0 %v1266_v37, 256 }
 0x1ae   : > { %1233 = vbcast.lane.b32.xlu1 %v1231_v30, 256 }
 0x1af   : > { %v884_v17 = vpop.permute.xlu0 %883  ;;  %v3050_v60 = vpop.permute.xlu1 %1037 }
 0x1b0   : > { %1282 = vbcast.lane.b32.xlu0 %v1280_v18, 256 }
 0x1b2   : > { %1247 = vbcast.lane.b32.xlu1 %v1245_v34, 256 }
 0x1b3   : > { %v891_v29 = vpop.permute.xlu0 %890  ;;  %v3052_v54 = vpop.permute.xlu1 %1051 }
 0x1b6   : > { %1261 = vbcast.lane.b32.xlu1 %v1259_v51, 256 }
 0x1b7   : > { %v905_v32 = vpop.permute.xlu0 %904  ;;  %v3054_v40 = vpop.permute.xlu1 %1065 }
 0x1ba   : > { %1275 = vbcast.lane.b32.xlu1 %v1273_v52, 256 }
 0x1bb   : > { %v912_v58 = vpop.permute.xlu0 %911  ;;  %v3056_v2 = vpop.permute.xlu1 %1079 }
 0x1bf   : > { %v919_v42 = vpop.permute.xlu0 %918  ;;  %v3058_v28 = vpop.permute.xlu1 %1093 }
 0x1c3   : > { %v926_v3 = vpop.permute.xlu0 %925  ;;  %v3060_v45 = vpop.permute.xlu1 %1107 }
 0x1c7   : > { %v933_v55 = vpop.permute.xlu0 %932  ;;  %v3064_v9 = vpop.permute.xlu1 %1121 }
 0x1cb   : > { %v947_v61 = vpop.permute.xlu0 %946  ;;  %v3068_v11 = vpop.permute.xlu1 %1135 }
 0x1cf   : > { %v961_v8 = vpop.permute.xlu0 %960  ;;  %v3072_v14 = vpop.permute.xlu1 %1149 }
 0x1d3   : > { %v975_v6 = vpop.permute.xlu0 %974  ;;  %v3076_v57 = vpop.permute.xlu1 %1163 }
 0x1d7   : > { %v3062_v63 = vpop.permute.xlu0 %988  ;;  %v3080_v36 = vpop.permute.xlu1 %1177 }
 0x1db   : > { %v3066_v56 = vpop.permute.xlu0 %1002  ;;  %v3084_v43 = vpop.permute.xlu1 %1191 }
 0x1df   : > { %v3070_v25 = vpop.permute.xlu0 %1016 }
 0x1e3   : > { %v3074_v59 = vpop.permute.xlu0 %1030 }
 0x1e7   : > { %v3078_v1 = vpop.permute.xlu0 %1044 }
 0x1eb   : > { %v3082_v15 = vpop.permute.xlu0 %1058 }
 0x1ef   : > { %v3086_v7 = vpop.permute.xlu0 %1072 }
 0x1f3   : > { %v3089_v13 = vpop.permute.xlu0 %1086 }
 0x1f7   : > { %v3097_v10 = vpop.permute.xlu0 %1100 }
 0x1fb   : > { %v3104_v24 = vpop.permute.xlu0 %1114 }
 0x1ff   : > { %v1129_v4 = vpop.permute.xlu0 %1128 }
 0x203   : > { %v3113_v30 = vpop.permute.xlu0 %1142 }
 0x21e   : > { %v807_v41 = vpop.xlane.xlu1 %806 }
 0x21f   : > { %v818_v46 = vadd.f32 %v3004_v16, %v807_v41 }
 0x221   : > { %v3091_v47 = vmax.f32 %v818_v46, 0.0 }
 0x223   : > { %v1348_v53 = vmul.f32 %v3009_v19, %v3091_v47  ;;  %v1349_v62 = vmul.f32 %v3015_v0, %v3091_v47  ;;  %v1350_v20 = vmul.f32 %v3023_v27, %v3091_v47  ;;  %v1351_v22 = vmul.f32 %v863_v38, %v3091_v47 }
 0x224   : > { %v1352_v16 = vmul.f32 %v870_v48, %v3091_v47  ;;  %v1353_v23 = vmul.f32 %v877_v12, %v3091_v47  ;;  %v1354_v19 = vmul.f32 %v884_v17, %v3091_v47  ;;  %v1355_v0 = vmul.f32 %v891_v29, %v3091_v47  ;;  %v3117_v48 = vpop.permute.xlu0 %1156 }
 0x225   : > { %1477 = vperm.xlu1 %2355, %v1348_v53   ;;  %1480 = vperm.xlu0 %2354, %v1349_v62   ;;  %v1356_v27 = vmul.f32 %v3028_v35, %v3091_v47  ;;  %v1357_v33 = vmul.f32 %v905_v32, %v3091_v47  ;;  %v1358_v37 = vmul.f32 %v912_v58, %v3091_v47 }
 0x226   : > { %v1359_v38 = vmul.f32 %v919_v42, %v3091_v47  ;;  %v1360_v18 = vmul.f32 %v926_v3, %v3091_v47  ;;  %v1361_v34 = vmul.f32 %v933_v55, %v3091_v47  ;;  %v1362_v35 = vmul.f32 %v3033_v39, %v3091_v47 }
 0x227   : > { %v1363_v51 = vmul.f32 %v947_v61, %v3091_v47  ;;  %v1364_v12 = vmul.f32 %v3037_v21, %v3091_v47  ;;  %v1365_v52 = vmul.f32 %v961_v8, %v3091_v47  ;;  %v1366_v29 = vmul.f32 %v3040_v26, %v3091_v47  ;;  %v1206_v61 = vpop.permute.xlu1 %1205 }
 0x228   : > { %v3125_v17 = vpop.permute.xlu0 %1170  ;;  %v1367_v32 = vmul.f32 %v975_v6, %v3091_v47  ;;  %v1368_v58 = vmul.f32 %v3042_v49, %v3091_v47  ;;  %v1369_v21 = vmul.f32 %v3062_v63, %v3091_v47  ;;  %v1370_v42 = vmul.f32 %v3044_v50, %v3091_v47 }
 0x229   : > { %1483 = vperm.xlu1 %2355, %v1350_v20   ;;  %1486 = vperm.xlu0 %2354, %v1351_v22   ;;  %v1371_v3 = vmul.f32 %v3066_v56, %v3091_v47  ;;  %v1372_v55 = vmul.f32 %v3046_v44, %v3091_v47  ;;  %v1373_v49 = vmul.f32 %v3070_v25, %v3091_v47 }
 0x22a   : > { %v1380_v6 = vmul.f32 %v3054_v40, %v3091_v47  ;;  %v1381_v50 = vmul.f32 %v3086_v7, %v3091_v47  ;;  %v1388_v44 = vmul.f32 %v3064_v9, %v3091_v47  ;;  %v1389_v56 = vmul.f32 %v1129_v4, %v3091_v47 }
 0x22b   : > { %v3146_v63 = vpop.permute.xlu1 %1219  ;;  %v1396_v41 = vmul.f32 %v3080_v36, %v3091_v47  ;;  %v1374_v9 = vmul.f32 %v3048_v5, %v3091_v47  ;;  %v1382_v20 = vmul.f32 %v3056_v2, %v3091_v47  ;;  %v1390_v36 = vmul.f32 %v3068_v11, %v3091_v47 }
 0x22c   : > { %v1185_v39 = vpop.permute.xlu0 %1184  ;;  %v1398_v22 = vmul.f32 %v3084_v43, %v3091_v47  ;;  %v1383_v5 = vmul.f32 %v3089_v13, %v3091_v47  ;;  %v1391_v2 = vmul.f32 %v3113_v30, %v3091_v47  ;;  %v1384_v4 = vmul.f32 %v3058_v28, %v3091_v47 }
 0x22d   : > { %1489 = vperm.xlu1 %2355, %v1352_v16   ;;  %1492 = vperm.xlu0 %2354, %v1353_v23   ;;  %v1397_v40 = vmul.f32 %v1185_v39, %v3091_v47  ;;  %v1392_v13 = vmul.f32 %v3072_v14, %v3091_v47  ;;  %v1393_v28 = vmul.f32 %v3117_v48, %v3091_v47 }
 0x22e   : > { %v1402_v48 = vmul.f32 %v3146_v63, %v3091_v47 }
 0x22f   : > { %v1234_v46 = vpop.permute.xlu1 %1233 }
 0x230   : > { %v1199_v26 = vpop.permute.xlu0 %1198  ;;  %v1404_v53 = vmul.f32 %v1234_v46, %v3091_v47 }
 0x231   : > { %1495 = vperm.xlu1 %2355, %v1354_v19   ;;  %1498 = vperm.xlu0 %2354, %v1355_v0   ;;  %v1375_v19 = vmul.f32 %v3074_v59, %v3091_v47  ;;  %v1399_v43 = vmul.f32 %v1199_v26, %v3091_v47  ;;  %v1376_v59 = vmul.f32 %v3050_v60, %v3091_v47 }
 0x232   : > { %v1385_v60 = vmul.f32 %v3097_v10, %v3091_v47  ;;  %v1394_v10 = vmul.f32 %v3076_v57, %v3091_v47 }
 0x233   : > { %v1248_v16 = vpop.permute.xlu1 %1247 }
 0x234   : > { %v1213_v8 = vpop.permute.xlu0 %1212  ;;  %v1406_v23 = vmul.f32 %v1248_v16, %v3091_v47 }
 0x235   : > { %1501 = vperm.xlu1 %2355, %v1356_v27   ;;  %1504 = vperm.xlu0 %2354, %v1357_v33   ;;  %v1400_v27 = vmul.f32 %v1206_v61, %v3091_v47  ;;  %v1401_v14 = vmul.f32 %v1213_v8, %v3091_v47 }
 0x237   : > { %v1262_v33 = vpop.permute.xlu1 %1261 }
 0x238   : > { %v3151_v25 = vpop.permute.xlu0 %1226 }
 0x239   : > { %1507 = vperm.xlu1 %2355, %v1358_v37   ;;  %1510 = vperm.xlu0 %2354, %v1359_v38   ;;  %v1408_v37 = vmul.f32 %v1262_v33, %v3091_v47  ;;  %v1377_v38 = vmul.f32 %v3078_v1, %v3091_v47  ;;  %v1378_v1 = vmul.f32 %v3052_v54, %v3091_v47 }
 0x23a   : > { %v1387_v54 = vmul.f32 %v3104_v24, %v3091_v47 }
 0x23c   : > { %v1241_v7 = vpop.permute.xlu0 %1240 }
 0x23d   : > { %1513 = vperm.xlu1 %2355, %v1360_v18   ;;  %1516 = vperm.xlu0 %2354, %v1361_v34   ;;  %v1405_v62 = vmul.f32 %v1241_v7, %v3091_v47  ;;  %v1386_v34 = vmul.f32 %v3060_v45, %v3091_v47  ;;  %v1395_v45 = vmul.f32 %v3125_v17, %v3091_v47 }
 0x240   : > { %v1255_v11 = vpop.permute.xlu0 %1254 }
 0x241   : > { %1519 = vperm.xlu1 %2355, %v1362_v35   ;;  %1522 = vperm.xlu0 %2354, %v1363_v51   ;;  %v1407_v0 = vmul.f32 %v1255_v11, %v3091_v47  ;;  %v1276_v35 = vpop.permute.xlu1 %1275 }
 0x242   : > { %v1410_v51 = vmul.f32 %v1276_v35, %v3091_v47 }
 0x244   : > { %v1269_v30 = vpop.permute.xlu0 %1268 }
 0x245   : > { %1525 = vperm.xlu1 %2355, %v1364_v12   ;;  %1528 = vperm.xlu0 %2354, %v1365_v52   ;;  %v1409_v18 = vmul.f32 %v1269_v30, %v3091_v47  ;;  %v1379_v12 = vmul.f32 %v3082_v15, %v3091_v47  ;;  %v1403_v52 = vmul.f32 %v3151_v25, %v3091_v47  ;;  %v3212_v15 = vld [vmem:[%s3467_s4] ss:$0 sm:$0xff] }
 0x248   : > { %v1283_v57 = vpop.permute.xlu0 %1282 }
 0x249   : > { %1531 = vperm.xlu1 %2355, %v1366_v29   ;;  %1534 = vperm.xlu0 %2354, %v1367_v32   ;;  %v1411_v29 = vmul.f32 %v1283_v57, %v3091_v47 }
 0x24d   : > { %1537 = vperm.xlu1 %2355, %v1368_v58   ;;  %1540 = vperm.xlu0 %2354, %v1369_v21  }
 0x251   : > { %1543 = vperm.xlu1 %2355, %v1370_v42   ;;  %1546 = vperm.xlu0 %2354, %v1371_v3  }
 0x255   : > { %1549 = vperm.xlu1 %2355, %v1372_v55   ;;  %1552 = vperm.xlu0 %2354, %v1373_v49  }
 0x259   : > { %1573 = vperm.xlu1 %2355, %v1380_v6   ;;  %1576 = vperm.xlu0 %2354, %v1381_v50  }
 0x25d   : > { %1597 = vperm.xlu1 %2355, %v1388_v44   ;;  %1600 = vperm.xlu0 %2354, %v1389_v56  }
 0x261   : > { %1621 = vperm.xlu1 %2355, %v1396_v41   ;;  %1624 = vperm.xlu0 %2354, %v1397_v40  }
 0x265   : > { %1645 = vperm.xlu1 %2355, %v1404_v53   ;;  %1648 = vperm.xlu0 %2354, %v1405_v62  }
 0x269   : > { %1555 = vperm.xlu1 %2355, %v1374_v9   ;;  %1579 = vperm.xlu0 %2354, %v1382_v20  }
 0x26d   : > { %1603 = vperm.xlu1 %2355, %v1390_v36   ;;  %1627 = vperm.xlu0 %2354, %v1398_v22  }
 0x271   : > { %1651 = vperm.xlu1 %2355, %v1406_v23   ;;  %1558 = vperm.xlu0 %2354, %v1375_v19  }
 0x275   : > { %1582 = vperm.xlu1 %2355, %v1383_v5   ;;  %1606 = vperm.xlu0 %2354, %v1391_v2  }
 0x279   : > { %1630 = vperm.xlu1 %2355, %v1399_v43   ;;  %1654 = vperm.xlu0 %2354, %v1407_v0  }
 0x27d   : > { %1561 = vperm.xlu1 %2355, %v1376_v59   ;;  %1585 = vperm.xlu0 %2354, %v1384_v4  }
 0x281   : > { %1609 = vperm.xlu1 %2355, %v1392_v13   ;;  %1633 = vperm.xlu0 %2354, %v1400_v27  }
 0x285   : > { %1657 = vperm.xlu1 %2355, %v1408_v37   ;;  %1564 = vperm.xlu0 %2354, %v1377_v38  }
 0x289   : > { %1588 = vperm.xlu1 %2355, %v1385_v60   ;;  %1612 = vperm.xlu0 %2354, %v1393_v28  }
 0x28d   : > { %1636 = vperm.xlu1 %2355, %v1401_v14   ;;  %1660 = vperm.xlu0 %2354, %v1409_v18  }
 0x291   : > { %1567 = vperm.xlu1 %2355, %v1378_v1   ;;  %1591 = vperm.xlu0 %2354, %v1386_v34  }
 0x295   : > { %1615 = vperm.xlu1 %2355, %v1394_v10   ;;  %1639 = vperm.xlu0 %2354, %v1402_v48  }
 0x299   : > { %1663 = vperm.xlu1 %2355, %v1410_v51   ;;  %1570 = vperm.xlu0 %2354, %v1379_v12  }
 0x29d   : > { %1594 = vperm.xlu1 %2355, %v1387_v54   ;;  %1618 = vperm.xlu0 %2354, %v1395_v45  }
 0x2a0   : > { %v1478_v32 = vpop.permute.xlu1 %1477  ;;  %v1481_v39 = vpop.permute.xlu0 %1480 }
 0x2a1   : > { %1642 = vperm.xlu1 %2355, %v1403_v52   ;;  %1666 = vperm.xlu0 %2354, %v1411_v29   ;;  %v1671_v44 = vrot.slane %v1478_v32, %v2903_v31  ;;  %v1675_v56 = vrot.slane %v1481_v39, %v2903_v31 }
 0x2a3   : > { %v1924_v9 = vsel %vm797_vm7, %v1675_v56, %v1671_v44 }
 0x2a4   : > { %v1484_v24 = vpop.permute.xlu1 %1483  ;;  %v1487_v58 = vpop.permute.xlu0 %1486 }
 0x2a5   : > { %2028 = vbcast.lane.b32.xlu1 %v3212_v15, 264  ;;  %2024 = vbcast.lane.b32.xlu0 %v3212_v15, 256  ;;  %v1679_v41 = vrot.slane %v1484_v24, %v2903_v31  ;;  %v1683_v20 = vrot.slane %v1487_v58, %v2903_v31 }
 0x2a7   : > { %v1925_v22 = vsel %vm799_vm8, %v1679_v41, %v1924_v9 }
 0x2a8   : > { %v1490_v17 = vpop.permute.xlu1 %1489  ;;  %v1493_v21 = vpop.permute.xlu0 %1492  ;;  %v1926_v59 = vsel %vm801_vm9, %v1683_v20, %v1925_v22 }
 0x2a9   : > { %2032 = vbcast.lane.b32.xlu1 %v3212_v15, 272  ;;  %2036 = vbcast.lane.b32.xlu0 %v3212_v15, 280  ;;  %v1687_v16 = vrot.slane %v1490_v17, %v2903_v31  ;;  %v1691_v4 = vrot.slane %v1493_v21, %v2903_v31 }
 0x2ab   : > { %v1928_v27 = vsel %vm1927_vm11, %v1687_v16, %v1926_v59 }
 0x2ac   : > { %v1496_v47 = vpop.permute.xlu1 %1495  ;;  %v3218_v42 = vpop.permute.xlu0 %1498  ;;  %v1930_v10 = vsel %vm1929_vm12, %v1691_v4, %v1928_v27 }
 0x2ad   : > { %2040 = vbcast.lane.b32.xlu1 %v3212_v15, 288  ;;  %2044 = vbcast.lane.b32.xlu0 %v3212_v15, 296  ;;  %v1695_v28 = vrot.slane %v1496_v47, %v2903_v31  ;;  %v1699_v48 = vrot.slane %v3218_v42, %v2903_v31 }
 0x2af   : > { %v1932_v57 = vsel %vm1931_vm13, %v1695_v28, %v1930_v10 }
 0x2b0   : > { %v1502_v3 = vpop.permute.xlu1 %1501  ;;  %v1505_v26 = vpop.permute.xlu0 %1504  ;;  %v1934_v58 = vsel %vm1933_vm14, %v1699_v48, %v1932_v57 }
 0x2b1   : > { %v1703_v8 = vrot.slane %v1502_v3, %v2903_v31  ;;  %v1707_v6 = vrot.slane %v1505_v26, %v2903_v31  ;;  %v1993_v3 = vsel %vm1992_vm15, %v1934_v58, 0.0 }
 0x2b3   : > { %v1935_v40 = vsel %vm797_vm7, %v1707_v6, %v1703_v8 }
 0x2b4   : > { %v1508_v55 = vpop.permute.xlu1 %1507  ;;  %v1511_v49 = vpop.permute.xlu0 %1510 }
 0x2b5   : > { %v1711_v63 = vrot.slane %v1508_v55, %v2903_v31  ;;  %v1715_v46 = vrot.slane %v1511_v49, %v2903_v31 }
 0x2b7   : > { %v1936_v53 = vsel %vm799_vm8, %v1711_v63, %v1935_v40 }
 0x2b8   : > { %v1514_v61 = vpop.permute.xlu1 %1513  ;;  %v1517_v50 = vpop.permute.xlu0 %1516  ;;  %v1937_v23 = vsel %vm801_vm9, %v1715_v46, %v1936_v53 }
 0x2b9   : > { %v1719_v62 = vrot.slane %v1514_v61, %v2903_v31  ;;  %v1723_v19 = vrot.slane %v1517_v50, %v2903_v31 }
 0x2bb   : > { %v1938_v2 = vsel %vm1927_vm11, %v1719_v62, %v1937_v23 }
 0x2bc   : > { %v1520_v25 = vpop.permute.xlu1 %1519  ;;  %v1523_v7 = vpop.permute.xlu0 %1522  ;;  %v1939_v33 = vsel %vm1929_vm12, %v1723_v19, %v1938_v2 }
 0x2bd   : > { %v1727_v11 = vrot.slane %v1520_v25, %v2903_v31  ;;  %v1731_v37 = vrot.slane %v1523_v7, %v2903_v31 }
 0x2bf   : > { %v1940_v18 = vsel %vm1931_vm13, %v1727_v11, %v1939_v33 }
 0x2c0   : > { %v1526_v36 = vpop.permute.xlu1 %1525  ;;  %v1529_v5 = vpop.permute.xlu0 %1528  ;;  %v1941_v12 = vsel %vm1933_vm14, %v1731_v37, %v1940_v18 }
 0x2c1   : > { %v1735_v43 = vrot.slane %v1526_v36, %v2903_v31  ;;  %v1739_v0 = vrot.slane %v1529_v5, %v2903_v31  ;;  %v1996_v32 = vsel %vm1992_vm15, %v1941_v12, 0.0 }
 0x2c3   : > { %v1942_v30 = vsel %vm797_vm7, %v1739_v0, %v1735_v43 }
 0x2c4   : > { %v1532_v13 = vpop.permute.xlu1 %1531  ;;  %v1535_v60 = vpop.permute.xlu0 %1534 }
 0x2c5   : > { %v1743_v38 = vrot.slane %v1532_v13, %v2903_v31  ;;  %v1747_v14 = vrot.slane %v1535_v60, %v2903_v31 }
 0x2c7   : > { %v1943_v1 = vsel %vm799_vm8, %v1743_v38, %v1942_v30 }
 0x2c8   : > { %v1538_v34 = vpop.permute.xlu1 %1537  ;;  %v1541_v51 = vpop.permute.xlu0 %1540  ;;  %v1944_v54 = vsel %vm801_vm9, %v1747_v14, %v1943_v1 }
 0x2c9   : > { %v1751_v35 = vrot.slane %v1538_v34, %v2903_v31  ;;  %v1755_v45 = vrot.slane %v1541_v51, %v2903_v31 }
 0x2cb   : > { %v1945_v52 = vsel %vm1927_vm11, %v1751_v35, %v1944_v54 }
 0x2cc   : > { %v1544_v29 = vpop.permute.xlu1 %1543  ;;  %1997 = vadd.xlane.f32.xlu0 %v1996_v32  ;;  %v1547_v24 = vpop.permute.xlu0 %1546  ;;  %v1946_v17 = vsel %vm1929_vm12, %v1755_v45, %v1945_v52 }
 0x2cd   : > { %v1759_v39 = vrot.slane %v1544_v29, %v2903_v31  ;;  %v1763_v21 = vrot.slane %v1547_v24, %v2903_v31 }
 0x2cf   : > { %v1947_v47 = vsel %vm1931_vm13, %v1759_v39, %v1946_v17 }
 0x2d0   : > { %v1550_v42 = vpop.permute.xlu1 %1549  ;;  %v1948_v26 = vsel %vm1933_vm14, %v1763_v21, %v1947_v47  ;;  %v1553_v55 = vpop.permute.xlu0 %1552 }
 0x2d1   : > { %1994 = vadd.xlane.f32.xlu1 %v1993_v3  ;;  %v1999_v49 = vsel %vm1992_vm15, %v1948_v26, 0.0  ;;  %v1767_v13 = vrot.slane %v1550_v42, %v2903_v31  ;;  %v1771_v27 = vrot.slane %v1553_v55, %v2903_v31 }
 0x2d2   : > { %2000 = vadd.xlane.f32.xlu0 %v1999_v49 }
 0x2d3   : > { %v1949_v51 = vsel %vm797_vm7, %v1771_v27, %v1767_v13 }
 0x2d4   : > { %v1574_v61 = vpop.permute.xlu1 %1573  ;;  %v1577_v8 = vpop.permute.xlu0 %1576 }
 0x2d5   : > { %v1799_v33 = vrot.slane %v1574_v61, %v2903_v31  ;;  %v1803_v37 = vrot.slane %v1577_v8, %v2903_v31 }
 0x2d7   : > { %v1956_v45 = vsel %vm797_vm7, %v1803_v37, %v1799_v33 }
 0x2d8   : > { %v1598_v6 = vpop.permute.xlu1 %1597  ;;  %v1601_v50 = vpop.permute.xlu0 %1600 }
 0x2d9   : > { %v1831_v38 = vrot.slane %v1598_v6, %v2903_v31  ;;  %v1835_v60 = vrot.slane %v1601_v50, %v2903_v31 }
 0x2db   : > { %v1963_v57 = vsel %vm797_vm7, %v1835_v60, %v1831_v38 }
 0x2dc   : > { %v1622_v63 = vpop.permute.xlu1 %1621  ;;  %v1625_v44 = vpop.permute.xlu0 %1624 }
 0x2dd   : > { %v1863_v30 = vrot.slane %v1622_v63, %v2903_v31  ;;  %v1867_v14 = vrot.slane %v1625_v44, %v2903_v31 }
 0x2df   : > { %v1970_v39 = vsel %vm797_vm7, %v1867_v14, %v1863_v30 }
 0x2e0   : > { %v1646_v56 = vpop.permute.xlu1 %1645  ;;  %v1649_v25 = vpop.permute.xlu0 %1648 }
 0x2e1   : > { %v1895_v18 = vrot.slane %v1646_v56, %v2903_v31  ;;  %v1899_v1 = vrot.slane %v1649_v25, %v2903_v31 }
 0x2e3   : > { %v1977_v24 = vsel %vm797_vm7, %v1899_v1, %v1895_v18 }
 0x2e4   : > { %v1556_v41 = vpop.permute.xlu1 %1555  ;;  %v1580_v40 = vpop.permute.xlu0 %1579 }
 0x2e5   : > { %v1775_v10 = vrot.slane %v1556_v41, %v2903_v31  ;;  %v1807_v48 = vrot.slane %v1580_v40, %v2903_v31 }
 0x2e7   : > { %v1950_v47 = vsel %vm799_vm8, %v1775_v10, %v1949_v51  ;;  %v1957_v42 = vsel %vm799_vm8, %v1807_v48, %v1956_v45 }
 0x2e8   : > { %v1604_v46 = vpop.permute.xlu1 %1603  ;;  %v1628_v7 = vpop.permute.xlu0 %1627 }
 0x2e9   : > { %v1839_v35 = vrot.slane %v1604_v46, %v2903_v31  ;;  %v1871_v12 = vrot.slane %v1628_v7, %v2903_v31 }
 0x2eb   : > { %v1964_v3 = vsel %vm799_vm8, %v1839_v35, %v1963_v57  ;;  %v1971_v55 = vsel %vm799_vm8, %v1871_v12, %v1970_v39 }
 0x2ec   : > { %v1652_v53 = vpop.permute.xlu1 %1651  ;;  %v1559_v62 = vpop.permute.xlu0 %1558 }
 0x2ed   : > { %v1903_v54 = vrot.slane %v1652_v53, %v2903_v31  ;;  %v1779_v52 = vrot.slane %v1559_v62, %v2903_v31 }
 0x2ef   : > { %v1978_v49 = vsel %vm799_vm8, %v1903_v54, %v1977_v24  ;;  %v1951_v6 = vsel %vm801_vm9, %v1779_v52, %v1950_v47 }
 0x2f0   : > { %v1583_v9 = vpop.permute.xlu1 %1582  ;;  %v1607_v20 = vpop.permute.xlu0 %1606 }
 0x2f1   : > { %v1811_v29 = vrot.slane %v1583_v9, %v2903_v31  ;;  %v1843_v58 = vrot.slane %v1607_v20, %v2903_v31 }
 0x2f3   : > { %v1958_v50 = vsel %vm801_vm9, %v1811_v29, %v1957_v42  ;;  %v1965_v25 = vsel %vm801_vm9, %v1843_v58, %v1964_v3 }
 0x2f4   : > { %v3271_v36 = vpop.permute.xlu1 %1630  ;;  %v3273_v22 = vpop.permute.xlu0 %1654 }
 0x2f5   : > { %v1875_v41 = vrot.slane %v3271_v36, %v2903_v31  ;;  %v1907_v53 = vrot.slane %v3273_v22, %v2903_v31 }
 0x2f7   : > { %v1972_v14 = vsel %vm801_vm9, %v1875_v41, %v1971_v55 }
 0x2f8   : > { %v1562_v16 = vpop.permute.xlu1 %1561  ;;  %v1586_v23 = vpop.permute.xlu0 %1585 }
 0x2f9   : > { %v1783_v17 = vrot.slane %v1562_v16, %v2903_v31  ;;  %v1815_v61 = vrot.slane %v1586_v23, %v2903_v31 }
 0x2fb   : > { %v1952_v40 = vsel %vm1927_vm11, %v1783_v17, %v1951_v6  ;;  %v1959_v16 = vsel %vm1927_vm11, %v1815_v61, %v1958_v50 }
 0x2fc   : > { %v3275_v19 = vpop.permute.xlu1 %1609  ;;  %v3277_v5 = vpop.permute.xlu0 %1633 }
 0x2fd   : > { %v1847_v63 = vrot.slane %v3275_v19, %v2903_v31  ;;  %v1879_v36 = vrot.slane %v3277_v5, %v2903_v31 }
 0x2ff   : > { %v1973_v10 = vsel %vm1927_vm11, %v1879_v36, %v1972_v14 }
 0x300   : > { %v3279_v2 = vpop.permute.xlu1 %1657  ;;  %v1565_v11 = vpop.permute.xlu0 %1564 }
 0x301   : > { %v1787_v26 = vrot.slane %v1565_v11, %v2903_v31  ;;  %v1966_v11 = vsel %vm1927_vm11, %v1847_v63, %v1965_v25  ;;  %v1911_v22 = vrot.slane %v3279_v2, %v2903_v31 }
 0x303   : > { %v1953_v62 = vsel %vm1929_vm12, %v1787_v26, %v1952_v40 }
 0x304   : > { %v1589_v43 = vpop.permute.xlu1 %1588  ;;  %v3281_v0 = vpop.permute.xlu0 %1612 }
 0x305   : > { %v1819_v44 = vrot.slane %v1589_v43, %v2903_v31  ;;  %v1851_v46 = vrot.slane %v3281_v0, %v2903_v31 }
 0x307   : > { %v1960_v43 = vsel %vm1929_vm12, %v1819_v44, %v1959_v16  ;;  %v1967_v27 = vsel %vm1929_vm12, %v1851_v46, %v1966_v11 }
 0x308   : > { %v3283_v59 = vpop.permute.xlu1 %1636  ;;  %v3285_v4 = vpop.permute.xlu0 %1660 }
 0x309   : > { %v1883_v33 = vrot.slane %v3283_v59, %v2903_v31  ;;  %v1915_v60 = vrot.slane %v3285_v4, %v2903_v31 }
 0x30b   : > { %v1974_v12 = vsel %vm1929_vm12, %v1883_v33, %v1973_v10 }
 0x30c   : > { %v1568_v28 = vpop.permute.xlu1 %1567  ;;  %v1592_v34 = vpop.permute.xlu0 %1591 }
 0x30d   : > { %v1791_v8 = vrot.slane %v1568_v28, %v2903_v31  ;;  %v1823_v9 = vrot.slane %v1592_v34, %v2903_v31  ;;  %v1979_v34 = vsel %vm801_vm9, %v1907_v53, %v1978_v49 }
 0x30e   : > { %v1980_v51 = vsel %vm1927_vm11, %v1911_v22, %v1979_v34 }
 0x30f   : > { %v1954_v19 = vsel %vm1931_vm13, %v1791_v8, %v1953_v62  ;;  %v1961_v30 = vsel %vm1931_vm13, %v1823_v9, %v1960_v43  ;;  %v1981_v52 = vsel %vm1929_vm12, %v1915_v60, %v1980_v51 }
 0x310   : > { %v1616_v32 = vpop.permute.xlu1 %1615  ;;  %v1640_v21 = vpop.permute.xlu0 %1639 }
 0x311   : > { %v1855_v23 = vrot.slane %v1616_v32, %v2903_v31  ;;  %v1887_v2 = vrot.slane %v1640_v21, %v2903_v31 }
 0x313   : > { %v1968_v1 = vsel %vm1931_vm13, %v1855_v23, %v1967_v27  ;;  %v1975_v32 = vsel %vm1931_vm13, %v1887_v2, %v1974_v12 }
 0x314   : > { %v1664_v56 = vpop.permute.xlu1 %1663  ;;  %v1571_v7 = vpop.permute.xlu0 %1570 }
 0x315   : > { %v1795_v20 = vrot.slane %v1571_v7, %v2903_v31  ;;  %v1919_v18 = vrot.slane %v1664_v56, %v2903_v31 }
 0x317   : > { %v1955_v13 = vsel %vm1933_vm14, %v1795_v20, %v1954_v19  ;;  %v1982_v24 = vsel %vm1931_vm13, %v1919_v18, %v1981_v52 }
 0x318   : > { %v1595_v0 = vpop.permute.xlu1 %1594  ;;  %v1619_v37 = vpop.permute.xlu0 %1618  ;;  %v2002_v38 = vsel %vm1992_vm15, %v1955_v13, 0.0 }
 0x319   : > { %v1827_v5 = vrot.slane %v1595_v0, %v2903_v31  ;;  %v1859_v28 = vrot.slane %v1619_v37, %v2903_v31  ;;  %2003 = vadd.xlane.f32.xlu1 %v2002_v38 }
 0x31b   : > { %v1962_v59 = vsel %vm1933_vm14, %v1827_v5, %v1961_v30  ;;  %v1969_v35 = vsel %vm1933_vm14, %v1859_v28, %v1968_v1 }
 0x31c   : > { %v1643_v4 = vpop.permute.xlu1 %1642  ;;  %v2005_v48 = vsel %vm1992_vm15, %v1962_v59, 0.0  ;;  %v1667_v45 = vpop.permute.xlu0 %1666  ;;  %v2008_v57 = vsel %vm1992_vm15, %v1969_v35, 0.0 }
 0x31d   : > { %v1891_v54 = vrot.slane %v1643_v4, %v2903_v31  ;;  %2006 = vadd.xlane.f32.xlu0 %v2005_v48  ;;  %v1923_v29 = vrot.slane %v1667_v45, %v2903_v31  ;;  %2009 = vadd.xlane.f32.xlu1 %v2008_v57 }
 0x31f   : > { %v1976_v39 = vsel %vm1933_vm14, %v1891_v54, %v1975_v32  ;;  %v1983_v17 = vsel %vm1933_vm14, %v1923_v29, %v1982_v24  ;;  %v2388_v29 = vld [vmem:[%s2638_s28 + $0x10] sm:$0xff] }
 0x320   : > { %v2011_v58 = vsel %vm1992_vm15, %v1976_v39, 0.0  ;;  %v2014_v21 = vsel %vm1992_vm15, %v1983_v17, 0.0  ;;  %v2025_v31 = vpop.permute.xlu0 %2024  ;;  %v2029_v47 = vpop.permute.xlu1 %2028  ;;  %v2389_v39 = vld [vmem:[%s2638_s28 + $0x18] sm:$0xff]  ;;  %v2390_v17 = vld [vmem:[%s2638_s28] sm:$0xff] }
 0x321   : > { %2012 = vadd.xlane.f32.xlu0 %v2011_v58  ;;  %2015 = vadd.xlane.f32.xlu1 %v2014_v21 }
 0x324   : > { %v2037_v42 = vpop.permute.xlu0 %2036  ;;  %v2033_v3 = vpop.permute.xlu1 %2032 }
 0x328   : > { %v2045_v26 = vpop.permute.xlu0 %2044  ;;  %v2041_v55 = vpop.permute.xlu1 %2040 }
 0x332   : > { %2048 = vbcast.lane.b32.xlu1 %v3212_v15, 304 }
 0x337   : > { %2052 = vbcast.lane.b32.xlu0 %v3212_v15, 312 }
 0x355   : > { %v1998_v49 = vpop.xlane.xlu0 %1997 }
 0x356   : > { %v2063_v61 = vadd.f32 %v2029_v47, %v1998_v49 }
 0x358   : > { %v2289_v8 = vmul.f32 -1.442695, %v2063_v61 }
 0x35a   : > { %v1995_v6 = vpop.xlane.xlu1 %1994  ;;  %2356 = vpow2.f32 %v2289_v8  ;;  %v2394_v8 = vld [vmem:[%s2638_s28 + $0x30] sm:$0xff] }
 0x35b   : > { %v2062_v50 = vadd.f32 %v2025_v31, %v1995_v6  ;;  %v2001_v63 = vpop.xlane.xlu0 %2000  ;;  %v2391_v31 = vld [vmem:[%s2638_s28 + $0x8] sm:$0xff] }
 0x35c   : > { %v2064_v44 = vadd.f32 %v2033_v3, %v2001_v63  ;;  %v2392_v3 = vld [vmem:[%s2638_s28 + $0x20] sm:$0xff] }
 0x35d   : > { %v2288_v56 = vmul.f32 -1.442695, %v2062_v50  ;;  %v2395_v50 = vld [vmem:[%s2638_s28 + $0x38] sm:$0xff] }
 0x35e   : > { %v2290_v25 = vmul.f32 -1.442695, %v2064_v44 }
 0x35f   : > { %2358 = vpow2.f32 %v2288_v56  ;;  %v2396_v56 = vld [vmem:[%s2638_s28 + $0x40] sm:$0xff] }
 0x360   : > { %2360 = vpow2.f32 %v2290_v25 }
 0x367   : > { %v2357_v41 = vpop.eup %2356 }
 0x368   : > { %v2095_v15 = vadd.f32 1.0, %v2357_v41  ;;  %v2397_v41 = vld [vmem:[%s2638_s28 + $0x48] sm:$0xff] }
 0x36a   : > { %2362 = vrcp.f32 %v2095_v15 }
 0x36c   : > { %v2359_v40 = vpop.eup %2358 }
 0x36d   : > { %v2361_v46 = vpop.eup %2360  ;;  %v2094_v7 = vadd.f32 1.0, %v2359_v40 }
 0x36e   : > { %v2096_v53 = vadd.f32 1.0, %v2361_v46  ;;  %v2398_v46 = vld [vmem:[%s2638_s28 + $0x50] sm:$0xff] }
 0x36f   : > { %2364 = vrcp.f32 %v2094_v7 }
 0x370   : > { %2366 = vrcp.f32 %v2096_v53  ;;  %v2399_v53 = vld [vmem:[%s2638_s28 + $0x58] sm:$0xff] }
 0x377   : > { %v2363_v62 = vpop.eup %2362 }
 0x378   : > { %2125 = vperm.xlu0 %2354, %v2363_v62  }
 0x37c   : > { %v2365_v9 = vpop.eup %2364 }
 0x37d   : > { %2120 = vperm.xlu1 %2355, %v2365_v9   ;;  %v2367_v20 = vpop.eup %2366 }
 0x381   : > { %2130 = vperm.xlu1 %2355, %v2367_v20  }
 0x3a2   : > { %v2004_v16 = vpop.xlane.xlu1 %2003 }
 0x3a3   : > { %v2065_v36 = vadd.f32 %v2037_v42, %v2004_v16  ;;  %v2400_v16 = vld [vmem:[%s2638_s28 + $0x70] sm:$0xff] }
 0x3a5   : > { %v2291_v23 = vmul.f32 -1.442695, %v2065_v36 }
 0x3a6   : > { %v2007_v19 = vpop.xlane.xlu0 %2006  ;;  %v2010_v11 = vpop.xlane.xlu1 %2009 }
 0x3a7   : > { %v2066_v22 = vadd.f32 %v2041_v55, %v2007_v19  ;;  %2368 = vpow2.f32 %v2291_v23  ;;  %v2067_v43 = vadd.f32 %v2045_v26, %v2010_v11  ;;  %v2393_v55 = vld [vmem:[%s2638_s28 + $0x28] sm:$0xff]  ;;  %v2401_v23 = vld [vmem:[%s2638_s28 + $0x78] sm:$0xff]  ;;  %v2402_v11 = vld [vmem:[%s2638_s28 + $0x60] sm:$0xff] }
 0x3a9   : > { %v2292_v0 = vmul.f32 -1.442695, %v2066_v22  ;;  %v2293_v13 = vmul.f32 -1.442695, %v2067_v43  ;;  %v2403_v43 = vld [vmem:[%s2638_s28 + $0x68] sm:$0xff] }
 0x3aa   : > { %v2013_v27 = vpop.xlane.xlu0 %2012  ;;  %v2016_v33 = vpop.xlane.xlu1 %2015 }
 0x3ab   : > { %2370 = vpow2.f32 %v2292_v0 }
 0x3ac   : > { %2372 = vpow2.f32 %v2293_v13 }
 0x3ae   : > { %v2053_v5 = vpop.permute.xlu0 %2052  ;;  %v2049_v37 = vpop.permute.xlu1 %2048 }
 0x3af   : > { %v2069_v38 = vadd.f32 %v2053_v5, %v2016_v33  ;;  %v2068_v60 = vadd.f32 %v2049_v37, %v2013_v27 }
 0x3b1   : > { %v2295_v2 = vmul.f32 -1.442695, %v2069_v38  ;;  %v2294_v28 = vmul.f32 -1.442695, %v2068_v60 }
 0x3b3   : > { %2374 = vpow2.f32 %v2295_v2 }
 0x3b4   : > { %2376 = vpow2.f32 %v2294_v28  ;;  %v2369_v30 = vpop.eup %2368 }
 0x3b5   : > { %v2097_v14 = vadd.f32 1.0, %v2369_v30 }
 0x3b7   : > { %2378 = vrcp.f32 %v2097_v14 }
 0x3b8   : > { %v2371_v18 = vpop.eup %2370 }
 0x3b9   : > { %v2373_v59 = vpop.eup %2372  ;;  %v2098_v1 = vadd.f32 1.0, %v2371_v18 }
 0x3ba   : > { %v2099_v34 = vadd.f32 1.0, %v2373_v59 }
 0x3bb   : > { %2380 = vrcp.f32 %v2098_v1 }
 0x3bc   : > { %2382 = vrcp.f32 %v2099_v34 }
 0x3c0   : > { %v2375_v10 = vpop.eup %2374 }
 0x3c1   : > { %v2377_v4 = vpop.eup %2376  ;;  %v2101_v48 = vadd.f32 1.0, %v2375_v10 }
 0x3c2   : > { %v2100_v35 = vadd.f32 1.0, %v2377_v4 }
 0x3c3   : > { %2384 = vrcp.f32 %v2101_v48 }
 0x3c4   : > { %2386 = vrcp.f32 %v2100_v35  ;;  %v2379_v51 = vpop.eup %2378 }
 0x3c5   : > { %2135 = vperm.xlu0 %2354, %v2379_v51  }
 0x3c8   : > { %v2381_v12 = vpop.eup %2380 }
 0x3c9   : > { %v2383_v54 = vpop.eup %2382  ;;  %2140 = vperm.xlu1 %2355, %v2381_v12  }
 0x3ca   : > { %2145 = vperm.xlu0 %2354, %v2383_v54  }
 0x3d0   : > { %v2385_v45 = vpop.eup %2384 }
 0x3d1   : > { %v2387_v57 = vpop.eup %2386  ;;  %2155 = vperm.xlu0 %2354, %v2385_v45  }
 0x3d2   : > { %2150 = vperm.xlu1 %2355, %v2387_v57  }
 0x3f3   : > { %v2126_v52 = vpop.permute.xlu0 %2125 }
 0x3f4   : > { %v2160_v32 = vmul.f32 %v2388_v29, %v2126_v52  ;;  %v2161_v24 = vmul.f32 %v2389_v39, %v2126_v52 }
 0x3f6   : > { %2176 = vst [vmem:[%s3381_s11 + $0x10] sm:$0xff] %v2160_v32  ;;  %2177 = vst [vmem:[%s3381_s11 + $0x18] sm:$0xff] %v2161_v24 }
 0x3f8   : > { %v2121_v58 = vpop.permute.xlu1 %2120 }
 0x3f9   : > { %v2158_v21 = vmul.f32 %v2390_v17, %v2121_v58  ;;  %v2159_v47 = vmul.f32 %v2391_v31, %v2121_v58 }
 0x3fb   : > { %2174 = vst [vmem:[%s3381_s11] sm:$0xff] %v2158_v21  ;;  %2175 = vst [vmem:[%s3381_s11 + $0x8] sm:$0xff] %v2159_v47 }
 0x3fc   : > { %v2131_v42 = vpop.permute.xlu1 %2130 }
 0x3fd   : > { %v2162_v26 = vmul.f32 %v2392_v3, %v2131_v42  ;;  %v2163_v49 = vmul.f32 %v2393_v55, %v2131_v42 }
 0x3ff   : > { %2178 = vst [vmem:[%s3381_s11 + $0x20] sm:$0xff] %v2162_v26  ;;  %2179 = vst [vmem:[%s3381_s11 + $0x28] sm:$0xff] %v2163_v49 }
 0x440   : > { %v2136_v61 = vpop.permute.xlu0 %2135 }
 0x441   : > { %v2164_v6 = vmul.f32 %v2394_v8, %v2136_v61  ;;  %v2165_v63 = vmul.f32 %v2395_v50, %v2136_v61 }
 0x443   : > { %2180 = vst [vmem:[%s3381_s11 + $0x30] sm:$0xff] %v2164_v6  ;;  %2181 = vst [vmem:[%s3381_s11 + $0x38] sm:$0xff] %v2165_v63 }
 0x444   : > { %v2141_v44 = vpop.permute.xlu1 %2140 }
 0x445   : > { %v2166_v25 = vmul.f32 %v2396_v56, %v2141_v44  ;;  %v2167_v15 = vmul.f32 %v2397_v41, %v2141_v44  ;;  %v2146_v40 = vpop.permute.xlu0 %2145 }
 0x446   : > { %v2168_v7 = vmul.f32 %v2398_v46, %v2146_v40  ;;  %v2169_v62 = vmul.f32 %v2399_v53, %v2146_v40 }
 0x447   : > { %2182 = vst [vmem:[%s3381_s11 + $0x40] sm:$0xff] %v2166_v25  ;;  %2183 = vst [vmem:[%s3381_s11 + $0x48] sm:$0xff] %v2167_v15 }
 0x448   : > { %2184 = vst [vmem:[%s3381_s11 + $0x50] sm:$0xff] %v2168_v7  ;;  %2185 = vst [vmem:[%s3381_s11 + $0x58] sm:$0xff] %v2169_v62 }
 0x44c   : > { %v2156_v9 = vpop.permute.xlu0 %2155 }
 0x44d   : > { %v2151_v20 = vpop.permute.xlu1 %2150  ;;  %v2172_v36 = vmul.f32 %v2400_v16, %v2156_v9  ;;  %v2173_v19 = vmul.f32 %v2401_v23, %v2156_v9 }
 0x44e   : > { %v2170_v22 = vmul.f32 %v2402_v11, %v2151_v20  ;;  %v2171_v0 = vmul.f32 %v2403_v43, %v2151_v20 }
 0x44f   : > { %2188 = vst [vmem:[%s3381_s11 + $0x70] sm:$0xff] %v2172_v36  ;;  %2189 = vst [vmem:[%s3381_s11 + $0x78] sm:$0xff] %v2173_v19 }
 0x450   : > { %2186 = vst [vmem:[%s3381_s11 + $0x60] sm:$0xff] %v2170_v22  ;;  %2187 = vst [vmem:[%s3381_s11 + $0x68] sm:$0xff] %v2171_v0 }
 0x451   : > { %2445 = shalt.err (!%p2442_p10)
}
 0x452   : > { %s2446_s28 = scalar_lea.hbm %s3412_s29, 2048  ;;  %s2450_s9 = scalar_lea.hbm %s3468_s5, 4096 }
 0x453   : > { %p2447_p0 = scmp.ne.s32.totalorder %s3412_s29, %s2446_s28  ;;  %p2451_p1 = scmp.lt.s32.totalorder %s3412_s29, %s3468_s5 }
 0x454   : > { %p2452_p3 = scmp.lt.s32.totalorder %s2450_s9, %s2446_s28 }
 0x455   : > { %p2448_p2 = pnand %p2447_p0, %p3477_p12 }
 0x456   : > { %p2453_p6 = por %p2452_p3, %p2451_p1 }
 0x457   : > { %p2449_p9 = pneg %p2448_p2 }
 0x459   : > { %p2454_p11 = pnand %p2453_p6, %p2449_p9 }
 0x45b   : > { %2457 = shalt.err (!%p2454_p11)
}
 0x45c   : > { %s2503_s25 = smov 256   ;;  %s2504_s17 = smov 16  }
 0x45d   : > { %2305 = dma.vmem_to_hbm [thread:$0]  (%p3477_p12), %s3414_s13, 2048, %s3412_s29, %s2191_s22, %s2503_s25, %s2503_s25, %s2504_s17  }
 0x45e PF: > { %s2219_s26 = sand.u32 1, %s2484_s18   ;;  %p3478_p13 = scmp.ne.s32.totalorder %s3474_s6, 0 }
 0x45f   : > { %p3479_p4 = scmp.ge.s32.totalorder %s2496_s21, 2  ;;  %s2220_s12 = scalar_lea.sflag [#allocation4], %s2219_s26 }
 0x461   : > { %p2312_p5 = pnand %p3479_p4, %p3478_p13 }
 0x463   : > { %p2313_p7 = pneg %p2312_p5 }
 0x465   : > { %2479 = dma.done.wait (%p2313_p7), %s2220_s12, 2048  }
 0x466   : > { %2481 = vsyncadd (%p2313_p7), %s2220_s12, 4294965248  ;;  %p18_p8 = scmp.ge.s32.totalorder %s2560_s24, 4   ;;  %s3480_s18 = smov %s2488_s19 }
 0x467   : > { %s3481_s19 = smov %s2492_s20  ;;  %s3482_s20 = smov %s2572_s27 }
 0x468   : > { %s3483_s21 = smov %s2560_s24  ;;  %20 = sbr.rel (!%p18_p8) target bundleno = 5 (0x5), region = 85 }
 0x46d   :  { %2225 = vsyncpa [#allocation3], 1 }
 0x46e   :  { %2227 = vsyncpa [#allocation3 + $0x1], 1 }
 0x46f   :  { %2228 = vsyncpa [#allocation4], 1 }
 0x470   :  { %2230 = vsyncpa [#allocation4 + $0x1], 1 }

</bundles_post_ra>
